<compile_context>
chip_gen: v7x
topology: tpu7x:2x2x1
jax: 0.10.0
libtpu: 0.0.40
codegen_flags: <defaults>
</compile_context>

<pallas_src>
import jax
import jax.numpy as jnp
from jax.experimental import pallas as pl
from jax.experimental.pallas import tpu as pltpu


# ---------------------------------------------------------------------------
# Fused dual-stream, multi-layer LSTM kernel (both streams packed along lanes)
# ---------------------------------------------------------------------------

def _make_dual_lstm_kernel(num_layers, seq_len, batch, hidden):
    """Kernel specialized for (L, S, B, H).  Combined hidden width W = 2H, gates G = 8H."""
    L, S, B, H = num_layers, seq_len, batch, hidden
    W = 2 * H      # both streams concatenated along lanes
    G = 8 * H      # 4 gates x 2 streams x H, gate-major / stream-minor

    def kernel(*refs):
        if L > 1:
            xproj_ref, whh_ref, wih_up_ref, b_up_ref, out_ref = refs
        else:
            xproj_ref, whh_ref, out_ref = refs
            wih_up_ref = b_up_ref = None

        # Load weights from VMEM once; reused by every unrolled time step.
        whh = [whh_ref[l] for l in range(L)]                      # (W, G) bf16
        if L > 1:
            wih_up = [wih_up_ref[l] for l in range(L - 1)]        # (W, G) bf16
            b_up = [b_up_ref[l] for l in range(L - 1)]            # (1, G) f32

        def cell(gates, c_prev):
            # Gate-major blocks of width W = 2H; within each block lanes are [stream0|stream1].
            i = jax.nn.sigmoid(gates[:, 0 * W:1 * W])
            f = jax.nn.sigmoid(gates[:, 1 * W:2 * W])
            g = jnp.tanh(gates[:, 2 * W:3 * W])
            o = jax.nn.sigmoid(gates[:, 3 * W:4 * W])
            c_new = f * c_prev + i * g
            h_new = o * jnp.tanh(c_new)
            return h_new, c_new

        zero = jnp.zeros((B, W), jnp.float32)
        hs = [zero] * L
        cs = [zero] * L

        # Statically unrolled recurrence: only h @ W_hh (and upper-layer projections of the
        # fresh lower-layer h) sit on the serial path; layer-0 x-projections were hoisted.
        for t in range(S):
            gates0 = xproj_ref[t] + jnp.dot(
                hs[0].astype(jnp.bfloat16), whh[0],
                preferred_element_type=jnp.float32)
            hs[0], cs[0] = cell(gates0, cs[0])
            for l in range(1, L):
                gates = (jnp.dot(hs[l - 1].astype(jnp.bfloat16), wih_up[l - 1],
                                 preferred_element_type=jnp.float32)
                         + jnp.dot(hs[l].astype(jnp.bfloat16), whh[l],
                                   preferred_element_type=jnp.float32)
                         + b_up[l - 1])
                hs[l], cs[l] = cell(gates, cs[l])

        # Final top-layer hidden of both streams, already in torch.cat order: (B, 2H).
        out_ref[...] = hs[L - 1]

    return kernel


def run_dual_lstm(xproj_cat, whh_bd, wih_up_bd=None, b_up_cat=None):
    """Run both LSTM stacks (all layers, all time steps) in one pallas_call.

    xproj_cat : (S, B, 8H) f32   hoisted layer-0 projections of both streams (gate-major cols)
    whh_bd    : (L, 2H, 8H) bf16 block-diagonal recurrent weights
    wih_up_bd : (L-1, 2H, 8H) bf16 block-diagonal input weights for layers >= 1
    b_up_cat  : (L-1, 1, 8H) f32  combined biases for layers >= 1
    returns   : (B, 2H) f32  final top-layer hidden = cat(stream0, stream1)
    """
    S, B, G = xproj_cat.shape
    H = G // 8
    W = 2 * H
    L = whh_bd.shape[0]

    kernel = _make_dual_lstm_kernel(L, S, B, H)

    in_specs = [
        pl.BlockSpec((S, B, G), lambda i: (0, 0, 0)),
        pl.BlockSpec((L, W, G), lambda i: (0, 0, 0)),
    ]
    operands = [xproj_cat, whh_bd]
    if L > 1:
        in_specs.append(pl.BlockSpec((L - 1, W, G), lambda i: (0, 0, 0)))
        in_specs.append(pl.BlockSpec((L - 1, 1, G), lambda i: (0, 0, 0)))
        operands += [wih_up_bd, b_up_cat]

    return pl.pallas_call(
        kernel,
        out_shape=jax.ShapeDtypeStruct((B, W), jnp.float32),
        grid_spec=pltpu.PrefetchScalarGridSpec(
            num_scalar_prefetch=0,
            grid=(1,),
            in_specs=in_specs,
            out_specs=pl.BlockSpec((B, W), lambda i: (0, 0)),
        ),
        compiler_params=pltpu.CompilerParams(
            dimension_semantics=("arbitrary",)),
    )(*operands)


# ---------------------------------------------------------------------------
# Parameter construction (deterministic, PyTorch-like init) + packing
# ---------------------------------------------------------------------------

def make_params(key, vocab1, vocab2, embed_size, num_hidden, num_layer):
    H = num_hidden
    k_emb1, k_emb2, k_l1, k_l2, k_out_w, k_out_b = jax.random.split(key, 6)

    def uniform(k, shape, bound):
        return jax.random.uniform(k, shape, jnp.float32, -bound, bound)

    def lstm_stream(k):
        """Per-layer PyTorch-layout weights for one nn.LSTM stack."""
        bound = float(1.0 / (H ** 0.5))
        ks = jax.random.split(k, num_layer * 4)
        layers = []
        for l in range(num_layer):
            in_sz = embed_size if l == 0 else H
            wih = uniform(ks[4 * l + 0], (4 * H, in_sz), bound)
            whh = uniform(ks[4 * l + 1], (4 * H, H), bound)
            bih = uniform(ks[4 * l + 2], (4 * H,), bound)
            bhh = uniform(ks[4 * l + 3], (4 * H,), bound)
            layers.append((wih.T, whh.T, bih + bhh))   # (in,4H), (H,4H), (4H,)
        return layers

    s1 = lstm_stream(k_l1)
    s2 = lstm_stream(k_l2)

    def interleave_gate_cols(a1, a2):
        # (..., 4H) per-stream [i f g o] columns -> (..., 8H) [i0 i1 f0 f1 g0 g1 o0 o1].
        r1 = a1.reshape(a1.shape[:-1] + (4, H))
        r2 = a2.reshape(a2.shape[:-1] + (4, H))
        return jnp.stack([r1, r2], axis=-2).reshape(a1.shape[:-1] + (8 * H,))

    def block_diag_gates(w1_t, w2_t):
        # (in, 4H) per stream -> (2*in, 8H) block-diagonal with gate-major/stream-minor cols.
        in_sz = w1_t.shape[0]
        r1 = w1_t.reshape(in_sz, 4, H)
        r2 = w2_t.reshape(in_sz, 4, H)
        z = jnp.zeros_like(r1)
        top = jnp.stack([r1, z], axis=-2)     # rows feeding stream-0 columns
        bot = jnp.stack([z, r2], axis=-2)     # rows feeding stream-1 columns
        return jnp.concatenate([top, bot], axis=0).reshape(2 * in_sz, 8 * H)

    whh_bd = jnp.stack([block_diag_gates(a[1], b[1])
                        for a, b in zip(s1, s2)]).astype(jnp.bfloat16)       # (L, 2H, 8H)
    if num_layer > 1:
        wih_up_bd = jnp.stack([block_diag_gates(a[0], b[0])
                               for a, b in zip(s1[1:], s2[1:])]).astype(jnp.bfloat16)
        b_up_cat = jnp.stack([interleave_gate_cols(a[2], b[2])
                              for a, b in zip(s1[1:], s2[1:])])[:, None, :]  # (L-1, 1, 8H)
    else:
        wih_up_bd = b_up_cat = None

    out_bound = float(1.0 / ((2 * H) ** 0.5))
    params = {
        "emb1": jax.random.normal(k_emb1, (vocab1, embed_size), jnp.float32),
        "emb2": jax.random.normal(k_emb2, (vocab2, embed_size), jnp.float32),
        "wih0_t": jnp.stack([s1[0][0], s2[0][0]]),          # (2, E, 4H) layer-0 input weights
        "b0": jnp.stack([s1[0][2], s2[0][2]]),               # (2, 4H)   layer-0 combined bias
        "whh_bd": whh_bd,                                    # (L, 2H, 8H) bf16
        "wih_up_bd": wih_up_bd,                              # (L-1, 2H, 8H) bf16 or None
        "b_up_cat": b_up_cat,                                # (L-1, 1, 8H) f32 or None
        "w_out_t": uniform(k_out_w, (2 * H, 1), out_bound),  # (2H, 1)
        "b_out": uniform(k_out_b, (1, 1), out_bound),        # (1, 1)
    }
    raw = {"stream1": s1, "stream2": s2}   # PyTorch-layout weights, for the reference check
    return params, raw


# ---------------------------------------------------------------------------
# Forward pass (mirrors TextLSTM.forward)
# ---------------------------------------------------------------------------

def text_lstm_forward(params, inputs1, inputs2):
    H = params["whh_bd"].shape[1] // 2
    # inputs: (B, S) int32 token ids; permute(1,0) -> seq-major (S, B).
    emb1 = jnp.take(params["emb1"], inputs1.T, axis=0)   # (S, B, E)
    emb2 = jnp.take(params["emb2"], inputs2.T, axis=0)   # (S, B, E)
    emb = jnp.stack([emb1, emb2], axis=0)                # (2, S, B, E)

    # Hoisted layer-0 input projection: one batched MXU-friendly matmul for both streams.
    xproj = (jnp.einsum("nsbe,neg->nsbg", emb, params["wih0_t"])
             + params["b0"][:, None, None, :])           # (2, S, B, 4H)

    # Repack into the kernel's combined layout: (S, B, 8H), columns [i0 i1 f0 f1 g0 g1 o0 o1].
    S, B = xproj.shape[1], xproj.shape[2]
    xproj_cat = (xproj.reshape(2, S, B, 4, H)
                 .transpose(1, 2, 3, 0, 4)
                 .reshape(S, B, 8 * H))

    if params["wih_up_bd"] is not None:
        h_top = run_dual_lstm(xproj_cat, params["whh_bd"],
                              params["wih_up_bd"], params["b_up_cat"])
    else:
        h_top = run_dual_lstm(xproj_cat, params["whh_bd"])   # (B, 2H)

    # h_top is already torch.cat((output1[-1], output2[-1]), -1).
    # Head left to XLA: (B,2H)@(2H,1)+sigmoid costs less than a kernel launch.
    return jax.nn.sigmoid(h_top @ params["w_out_t"] + params["b_out"])


# ---------------------------------------------------------------------------
# Pure-JAX reference (f32, PyTorch-layout weights) for correctness
# ---------------------------------------------------------------------------

def reference_forward(params, raw, inputs1, inputs2):
    def run_stack(emb, layers):
        S, B, _ = emb.shape
        H = layers[0][1].shape[0]
        x = emb
        for (wih_t, whh_t, b) in layers:
            h = jnp.zeros((B, H), jnp.float32)
            c = jnp.zeros((B, H), jnp.float32)
            outs = []
            for t in range(S):
                gates = x[t] @ wih_t + h @ whh_t + b
                i = jax.nn.sigmoid(gates[:, 0 * H:1 * H])
                f = jax.nn.sigmoid(gates[:, 1 * H:2 * H])
                g = jnp.tanh(gates[:, 2 * H:3 * H])
                o = jax.nn.sigmoid(gates[:, 3 * H:4 * H])
                c = f * c + i * g
                h = o * jnp.tanh(c)
                outs.append(h)
            x = jnp.stack(outs)
        return x[-1]

    emb1 = jnp.take(params["emb1"], inputs1.T, axis=0)
    emb2 = jnp.take(params["emb2"], inputs2.T, axis=0)
    h1 = run_stack(emb1, raw["stream1"])
    h2 = run_stack(emb2, raw["stream2"])
    enc = jnp.concatenate([h1, h2], axis=-1)
    return jax.nn.sigmoid(enc @ params["w_out_t"] + params["b_out"])


# ---------------------------------------------------------------------------
# Main
# ---------------------------------------------------------------------------

if __name__ == "__main__":
    VOCAB1, VOCAB2 = 50, 60
    EMBED, HIDDEN, LAYERS = 32, 32, 2
    BATCH, SEQ = 8, 8

    key = jax.random.PRNGKey(0)
    k_params, k_in1, k_in2 = jax.random.split(key, 3)

    params, raw = make_params(k_params, VOCAB1, VOCAB2, EMBED, HIDDEN, LAYERS)
    inputs1 = jax.random.randint(k_in1, (BATCH, SEQ), 0, VOCAB1, jnp.int32)
    inputs2 = jax.random.randint(k_in2, (BATCH, SEQ), 0, VOCAB2, jnp.int32)

    fwd = jax.jit(text_lstm_forward)
    out = fwd(params, inputs1, inputs2)   # (BATCH, 1)
    jax.block_until_ready(out)

    assert out.shape == (BATCH, 1)
    assert bool(jnp.all(jnp.isfinite(out)))
    assert bool(jnp.all((out >= 0.0) & (out <= 1.0)))

    # Correctness vs. f32 pure-JAX reference (kernel uses bf16 matmul operands -> loose tol).
    ref = reference_forward(params, raw, inputs1, inputs2)
    assert bool(jnp.all(jnp.abs(out - ref) < 2e-2)), "kernel deviates from reference"

    print("KERNEL_OK")
</pallas_src>

<mosaic_0001>
module attributes {stable_mosaic.version = 11 : i64} {
  func.func @kernel(%arg0: i32, %arg1: memref<8x8x256xf32, #tpu.memory_space<vmem>>, %arg2: memref<2x64x256xbf16, #tpu.memory_space<vmem>>, %arg3: memref<1x64x256xbf16, #tpu.memory_space<vmem>>, %arg4: memref<1x1x256xf32, #tpu.memory_space<vmem>>, %arg5: memref<8x64xf32, #tpu.memory_space<vmem>>) attributes {dimension_semantics = [#tpu.dimension_semantics<arbitrary>], iteration_bounds = array<i64: 1>, scalar_prefetch = 0 : i64, scratch_operands = 0 : i64, tpu.core_type = #tpu.core_type<tc>, window_params = [{pipeline_mode = #tpu.pipeline_mode<synchronous>, transform_indices = @transform_0, window_bounds = array<i64: 8, 8, 256>}, {pipeline_mode = #tpu.pipeline_mode<synchronous>, transform_indices = @transform_1, window_bounds = array<i64: 2, 64, 256>}, {pipeline_mode = #tpu.pipeline_mode<synchronous>, transform_indices = @transform_2, window_bounds = array<i64: 1, 64, 256>}, {pipeline_mode = #tpu.pipeline_mode<synchronous>, transform_indices = @transform_3, window_bounds = array<i64: 1, 1, 256>}, {pipeline_mode = #tpu.pipeline_mode<synchronous>, transform_indices = @transform_4, window_bounds = array<i64: 8, 64>}]} {
    %c0 = arith.constant 0 : index
    %c0_0 = arith.constant 0 : index
    %c0_1 = arith.constant 0 : index
    %0 = vector.load %arg2[%c0, %c0_0, %c0_1] : memref<2x64x256xbf16, #tpu.memory_space<vmem>>, vector<1x64x256xbf16>
    %1 = vector.shape_cast %0 : vector<1x64x256xbf16> to vector<64x256xbf16>
    %c1 = arith.constant 1 : index
    %c0_2 = arith.constant 0 : index
    %c0_3 = arith.constant 0 : index
    %2 = vector.load %arg2[%c1, %c0_2, %c0_3] : memref<2x64x256xbf16, #tpu.memory_space<vmem>>, vector<1x64x256xbf16>
    %3 = vector.shape_cast %2 : vector<1x64x256xbf16> to vector<64x256xbf16>
    %c0_4 = arith.constant 0 : index
    %c0_5 = arith.constant 0 : index
    %c0_6 = arith.constant 0 : index
    %4 = vector.load %arg3[%c0_4, %c0_5, %c0_6] : memref<1x64x256xbf16, #tpu.memory_space<vmem>>, vector<1x64x256xbf16>
    %5 = vector.shape_cast %4 : vector<1x64x256xbf16> to vector<64x256xbf16>
    %c0_7 = arith.constant 0 : index
    %c0_8 = arith.constant 0 : index
    %c0_9 = arith.constant 0 : index
    %6 = vector.load %arg4[%c0_7, %c0_8, %c0_9] : memref<1x1x256xf32, #tpu.memory_space<vmem>>, vector<1x1x256xf32>
    %7 = vector.shape_cast %6 : vector<1x1x256xf32> to vector<1x256xf32>
    %cst = arith.constant 0.000000e+00 : f32
    %8 = vector.broadcast %cst : f32 to vector<8x64xf32>
    %c0_10 = arith.constant 0 : index
    %c0_11 = arith.constant 0 : index
    %c0_12 = arith.constant 0 : index
    %9 = vector.load %arg1[%c0_10, %c0_11, %c0_12] : memref<8x8x256xf32, #tpu.memory_space<vmem>>, vector<1x8x256xf32>
    %10 = vector.shape_cast %9 : vector<1x8x256xf32> to vector<8x256xf32>
    %11 = arith.truncf %8 : vector<8x64xf32> to vector<8x64xbf16>
    %cst_13 = arith.constant dense<0.000000e+00> : vector<8x256xf32>
    %12 = tpu.matmul %11, %1, %cst_13 {dimension_numbers = #tpu.dot_dimension_numbers<[1], [0], [0], [1], [0, 0, 1, 1], [], []>} : vector<8x64xbf16>, vector<64x256xbf16>, vector<8x256xf32> -> vector<8x256xf32>
    %13 = arith.addf %10, %12 : vector<8x256xf32>
    %14 = vector.extract_strided_slice %13 {offsets = [0, 0], sizes = [8, 64], strides = [1, 1]} : vector<8x256xf32> to vector<8x64xf32>
    %15 = arith.negf %14 : vector<8x64xf32>
    %16 = math.exp %15 : vector<8x64xf32>
    %cst_14 = arith.constant 1.000000e+00 : f32
    %17 = vector.broadcast %cst_14 : f32 to vector<8x64xf32>
    %18 = arith.addf %17, %16 : vector<8x64xf32>
    %19 = arith.divf %17, %18 : vector<8x64xf32>
    %20 = vector.extract_strided_slice %13 {offsets = [0, 64], sizes = [8, 64], strides = [1, 1]} : vector<8x256xf32> to vector<8x64xf32>
    %21 = arith.negf %20 : vector<8x64xf32>
    %22 = math.exp %21 : vector<8x64xf32>
    %cst_15 = arith.constant 1.000000e+00 : f32
    %23 = vector.broadcast %cst_15 : f32 to vector<8x64xf32>
    %24 = arith.addf %23, %22 : vector<8x64xf32>
    %25 = arith.divf %23, %24 : vector<8x64xf32>
    %26 = vector.extract_strided_slice %13 {offsets = [0, 128], sizes = [8, 64], strides = [1, 1]} : vector<8x256xf32> to vector<8x64xf32>
    %27 = math.tanh %26 : vector<8x64xf32>
    %28 = vector.extract_strided_slice %13 {offsets = [0, 192], sizes = [8, 64], strides = [1, 1]} : vector<8x256xf32> to vector<8x64xf32>
    %29 = arith.negf %28 : vector<8x64xf32>
    %30 = math.exp %29 : vector<8x64xf32>
    %cst_16 = arith.constant 1.000000e+00 : f32
    %31 = vector.broadcast %cst_16 : f32 to vector<8x64xf32>
    %32 = arith.addf %31, %30 : vector<8x64xf32>
    %33 = arith.divf %31, %32 : vector<8x64xf32>
    %34 = arith.mulf %25, %8 : vector<8x64xf32>
    %35 = arith.mulf %19, %27 : vector<8x64xf32>
    %36 = arith.addf %34, %35 : vector<8x64xf32>
    %37 = math.tanh %36 : vector<8x64xf32>
    %38 = arith.mulf %33, %37 : vector<8x64xf32>
    %39 = arith.truncf %38 : vector<8x64xf32> to vector<8x64xbf16>
    %cst_17 = arith.constant dense<0.000000e+00> : vector<8x256xf32>
    %40 = tpu.matmul %39, %5, %cst_17 {dimension_numbers = #tpu.dot_dimension_numbers<[1], [0], [0], [1], [0, 0, 1, 1], [], []>} : vector<8x64xbf16>, vector<64x256xbf16>, vector<8x256xf32> -> vector<8x256xf32>
    %41 = arith.truncf %8 : vector<8x64xf32> to vector<8x64xbf16>
    %cst_18 = arith.constant dense<0.000000e+00> : vector<8x256xf32>
    %42 = tpu.matmul %41, %3, %cst_18 {dimension_numbers = #tpu.dot_dimension_numbers<[1], [0], [0], [1], [0, 0, 1, 1], [], []>} : vector<8x64xbf16>, vector<64x256xbf16>, vector<8x256xf32> -> vector<8x256xf32>
    %43 = arith.addf %40, %42 : vector<8x256xf32>
    %44 = vector.broadcast %7 : vector<1x256xf32> to vector<8x256xf32>
    %45 = arith.addf %43, %44 : vector<8x256xf32>
    %46 = vector.extract_strided_slice %45 {offsets = [0, 0], sizes = [8, 64], strides = [1, 1]} : vector<8x256xf32> to vector<8x64xf32>
    %47 = arith.negf %46 : vector<8x64xf32>
    %48 = math.exp %47 : vector<8x64xf32>
    %cst_19 = arith.constant 1.000000e+00 : f32
    %49 = vector.broadcast %cst_19 : f32 to vector<8x64xf32>
    %50 = arith.addf %49, %48 : vector<8x64xf32>
    %51 = arith.divf %49, %50 : vector<8x64xf32>
    %52 = vector.extract_strided_slice %45 {offsets = [0, 64], sizes = [8, 64], strides = [1, 1]} : vector<8x256xf32> to vector<8x64xf32>
    %53 = arith.negf %52 : vector<8x64xf32>
    %54 = math.exp %53 : vector<8x64xf32>
    %cst_20 = arith.constant 1.000000e+00 : f32
    %55 = vector.broadcast %cst_20 : f32 to vector<8x64xf32>
    %56 = arith.addf %55, %54 : vector<8x64xf32>
    %57 = arith.divf %55, %56 : vector<8x64xf32>
    %58 = vector.extract_strided_slice %45 {offsets = [0, 128], sizes = [8, 64], strides = [1, 1]} : vector<8x256xf32> to vector<8x64xf32>
    %59 = math.tanh %58 : vector<8x64xf32>
    %60 = vector.extract_strided_slice %45 {offsets = [0, 192], sizes = [8, 64], strides = [1, 1]} : vector<8x256xf32> to vector<8x64xf32>
    %61 = arith.negf %60 : vector<8x64xf32>
    %62 = math.exp %61 : vector<8x64xf32>
    %cst_21 = arith.constant 1.000000e+00 : f32
    %63 = vector.broadcast %cst_21 : f32 to vector<8x64xf32>
    %64 = arith.addf %63, %62 : vector<8x64xf32>
    %65 = arith.divf %63, %64 : vector<8x64xf32>
    %66 = arith.mulf %57, %8 : vector<8x64xf32>
    %67 = arith.mulf %51, %59 : vector<8x64xf32>
    %68 = arith.addf %66, %67 : vector<8x64xf32>
    %69 = math.tanh %68 : vector<8x64xf32>
    %70 = arith.mulf %65, %69 : vector<8x64xf32>
    %c1_22 = arith.constant 1 : index
    %c0_23 = arith.constant 0 : index
    %c0_24 = arith.constant 0 : index
    %71 = vector.load %arg1[%c1_22, %c0_23, %c0_24] : memref<8x8x256xf32, #tpu.memory_space<vmem>>, vector<1x8x256xf32>
    %72 = vector.shape_cast %71 : vector<1x8x256xf32> to vector<8x256xf32>
    %73 = arith.truncf %38 : vector<8x64xf32> to vector<8x64xbf16>
    %cst_25 = arith.constant dense<0.000000e+00> : vector<8x256xf32>
    %74 = tpu.matmul %73, %1, %cst_25 {dimension_numbers = #tpu.dot_dimension_numbers<[1], [0], [0], [1], [0, 0, 1, 1], [], []>} : vector<8x64xbf16>, vector<64x256xbf16>, vector<8x256xf32> -> vector<8x256xf32>
    %75 = arith.addf %72, %74 : vector<8x256xf32>
    %76 = vector.extract_strided_slice %75 {offsets = [0, 0], sizes = [8, 64], strides = [1, 1]} : vector<8x256xf32> to vector<8x64xf32>
    %77 = arith.negf %76 : vector<8x64xf32>
    %78 = math.exp %77 : vector<8x64xf32>
    %cst_26 = arith.constant 1.000000e+00 : f32
    %79 = vector.broadcast %cst_26 : f32 to vector<8x64xf32>
    %80 = arith.addf %79, %78 : vector<8x64xf32>
    %81 = arith.divf %79, %80 : vector<8x64xf32>
    %82 = vector.extract_strided_slice %75 {offsets = [0, 64], sizes = [8, 64], strides = [1, 1]} : vector<8x256xf32> to vector<8x64xf32>
    %83 = arith.negf %82 : vector<8x64xf32>
    %84 = math.exp %83 : vector<8x64xf32>
    %cst_27 = arith.constant 1.000000e+00 : f32
    %85 = vector.broadcast %cst_27 : f32 to vector<8x64xf32>
    %86 = arith.addf %85, %84 : vector<8x64xf32>
    %87 = arith.divf %85, %86 : vector<8x64xf32>
    %88 = vector.extract_strided_slice %75 {offsets = [0, 128], sizes = [8, 64], strides = [1, 1]} : vector<8x256xf32> to vector<8x64xf32>
    %89 = math.tanh %88 : vector<8x64xf32>
    %90 = vector.extract_strided_slice %75 {offsets = [0, 192], sizes = [8, 64], strides = [1, 1]} : vector<8x256xf32> to vector<8x64xf32>
    %91 = arith.negf %90 : vector<8x64xf32>
    %92 = math.exp %91 : vector<8x64xf32>
    %cst_28 = arith.constant 1.000000e+00 : f32
    %93 = vector.broadcast %cst_28 : f32 to vector<8x64xf32>
    %94 = arith.addf %93, %92 : vector<8x64xf32>
    %95 = arith.divf %93, %94 : vector<8x64xf32>
    %96 = arith.mulf %87, %36 : vector<8x64xf32>
    %97 = arith.mulf %81, %89 : vector<8x64xf32>
    %98 = arith.addf %96, %97 : vector<8x64xf32>
    %99 = math.tanh %98 : vector<8x64xf32>
    %100 = arith.mulf %95, %99 : vector<8x64xf32>
    %101 = arith.truncf %100 : vector<8x64xf32> to vector<8x64xbf16>
    %cst_29 = arith.constant dense<0.000000e+00> : vector<8x256xf32>
    %102 = tpu.matmul %101, %5, %cst_29 {dimension_numbers = #tpu.dot_dimension_numbers<[1], [0], [0], [1], [0, 0, 1, 1], [], []>} : vector<8x64xbf16>, vector<64x256xbf16>, vector<8x256xf32> -> vector<8x256xf32>
    %103 = arith.truncf %70 : vector<8x64xf32> to vector<8x64xbf16>
    %cst_30 = arith.constant dense<0.000000e+00> : vector<8x256xf32>
    %104 = tpu.matmul %103, %3, %cst_30 {dimension_numbers = #tpu.dot_dimension_numbers<[1], [0], [0], [1], [0, 0, 1, 1], [], []>} : vector<8x64xbf16>, vector<64x256xbf16>, vector<8x256xf32> -> vector<8x256xf32>
    %105 = arith.addf %102, %104 : vector<8x256xf32>
    %106 = vector.broadcast %7 : vector<1x256xf32> to vector<8x256xf32>
    %107 = arith.addf %105, %106 : vector<8x256xf32>
    %108 = vector.extract_strided_slice %107 {offsets = [0, 0], sizes = [8, 64], strides = [1, 1]} : vector<8x256xf32> to vector<8x64xf32>
    %109 = arith.negf %108 : vector<8x64xf32>
    %110 = math.exp %109 : vector<8x64xf32>
    %cst_31 = arith.constant 1.000000e+00 : f32
    %111 = vector.broadcast %cst_31 : f32 to vector<8x64xf32>
    %112 = arith.addf %111, %110 : vector<8x64xf32>
    %113 = arith.divf %111, %112 : vector<8x64xf32>
    %114 = vector.extract_strided_slice %107 {offsets = [0, 64], sizes = [8, 64], strides = [1, 1]} : vector<8x256xf32> to vector<8x64xf32>
    %115 = arith.negf %114 : vector<8x64xf32>
    %116 = math.exp %115 : vector<8x64xf32>
    %cst_32 = arith.constant 1.000000e+00 : f32
    %117 = vector.broadcast %cst_32 : f32 to vector<8x64xf32>
    %118 = arith.addf %117, %116 : vector<8x64xf32>
    %119 = arith.divf %117, %118 : vector<8x64xf32>
    %120 = vector.extract_strided_slice %107 {offsets = [0, 128], sizes = [8, 64], strides = [1, 1]} : vector<8x256xf32> to vector<8x64xf32>
    %121 = math.tanh %120 : vector<8x64xf32>
    %122 = vector.extract_strided_slice %107 {offsets = [0, 192], sizes = [8, 64], strides = [1, 1]} : vector<8x256xf32> to vector<8x64xf32>
    %123 = arith.negf %122 : vector<8x64xf32>
    %124 = math.exp %123 : vector<8x64xf32>
    %cst_33 = arith.constant 1.000000e+00 : f32
    %125 = vector.broadcast %cst_33 : f32 to vector<8x64xf32>
    %126 = arith.addf %125, %124 : vector<8x64xf32>
    %127 = arith.divf %125, %126 : vector<8x64xf32>
    %128 = arith.mulf %119, %68 : vector<8x64xf32>
    %129 = arith.mulf %113, %121 : vector<8x64xf32>
    %130 = arith.addf %128, %129 : vector<8x64xf32>
    %131 = math.tanh %130 : vector<8x64xf32>
    %132 = arith.mulf %127, %131 : vector<8x64xf32>
    %c2 = arith.constant 2 : index
    %c0_34 = arith.constant 0 : index
    %c0_35 = arith.constant 0 : index
    %133 = vector.load %arg1[%c2, %c0_34, %c0_35] : memref<8x8x256xf32, #tpu.memory_space<vmem>>, vector<1x8x256xf32>
    %134 = vector.shape_cast %133 : vector<1x8x256xf32> to vector<8x256xf32>
    %135 = arith.truncf %100 : vector<8x64xf32> to vector<8x64xbf16>
    %cst_36 = arith.constant dense<0.000000e+00> : vector<8x256xf32>
    %136 = tpu.matmul %135, %1, %cst_36 {dimension_numbers = #tpu.dot_dimension_numbers<[1], [0], [0], [1], [0, 0, 1, 1], [], []>} : vector<8x64xbf16>, vector<64x256xbf16>, vector<8x256xf32> -> vector<8x256xf32>
    %137 = arith.addf %134, %136 : vector<8x256xf32>
    %138 = vector.extract_strided_slice %137 {offsets = [0, 0], sizes = [8, 64], strides = [1, 1]} : vector<8x256xf32> to vector<8x64xf32>
    %139 = arith.negf %138 : vector<8x64xf32>
    %140 = math.exp %139 : vector<8x64xf32>
    %cst_37 = arith.constant 1.000000e+00 : f32
    %141 = vector.broadcast %cst_37 : f32 to vector<8x64xf32>
    %142 = arith.addf %141, %140 : vector<8x64xf32>
    %143 = arith.divf %141, %142 : vector<8x64xf32>
    %144 = vector.extract_strided_slice %137 {offsets = [0, 64], sizes = [8, 64], strides = [1, 1]} : vector<8x256xf32> to vector<8x64xf32>
    %145 = arith.negf %144 : vector<8x64xf32>
    %146 = math.exp %145 : vector<8x64xf32>
    %cst_38 = arith.constant 1.000000e+00 : f32
    %147 = vector.broadcast %cst_38 : f32 to vector<8x64xf32>
    %148 = arith.addf %147, %146 : vector<8x64xf32>
    %149 = arith.divf %147, %148 : vector<8x64xf32>
    %150 = vector.extract_strided_slice %137 {offsets = [0, 128], sizes = [8, 64], strides = [1, 1]} : vector<8x256xf32> to vector<8x64xf32>
    %151 = math.tanh %150 : vector<8x64xf32>
    %152 = vector.extract_strided_slice %137 {offsets = [0, 192], sizes = [8, 64], strides = [1, 1]} : vector<8x256xf32> to vector<8x64xf32>
    %153 = arith.negf %152 : vector<8x64xf32>
    %154 = math.exp %153 : vector<8x64xf32>
    %cst_39 = arith.constant 1.000000e+00 : f32
    %155 = vector.broadcast %cst_39 : f32 to vector<8x64xf32>
    %156 = arith.addf %155, %154 : vector<8x64xf32>
    %157 = arith.divf %155, %156 : vector<8x64xf32>
    %158 = arith.mulf %149, %98 : vector<8x64xf32>
    %159 = arith.mulf %143, %151 : vector<8x64xf32>
    %160 = arith.addf %158, %159 : vector<8x64xf32>
    %161 = math.tanh %160 : vector<8x64xf32>
    %162 = arith.mulf %157, %161 : vector<8x64xf32>
    %163 = arith.truncf %162 : vector<8x64xf32> to vector<8x64xbf16>
    %cst_40 = arith.constant dense<0.000000e+00> : vector<8x256xf32>
    %164 = tpu.matmul %163, %5, %cst_40 {dimension_numbers = #tpu.dot_dimension_numbers<[1], [0], [0], [1], [0, 0, 1, 1], [], []>} : vector<8x64xbf16>, vector<64x256xbf16>, vector<8x256xf32> -> vector<8x256xf32>
    %165 = arith.truncf %132 : vector<8x64xf32> to vector<8x64xbf16>
    %cst_41 = arith.constant dense<0.000000e+00> : vector<8x256xf32>
    %166 = tpu.matmul %165, %3, %cst_41 {dimension_numbers = #tpu.dot_dimension_numbers<[1], [0], [0], [1], [0, 0, 1, 1], [], []>} : vector<8x64xbf16>, vector<64x256xbf16>, vector<8x256xf32> -> vector<8x256xf32>
    %167 = arith.addf %164, %166 : vector<8x256xf32>
    %168 = vector.broadcast %7 : vector<1x256xf32> to vector<8x256xf32>
    %169 = arith.addf %167, %168 : vector<8x256xf32>
    %170 = vector.extract_strided_slice %169 {offsets = [0, 0], sizes = [8, 64], strides = [1, 1]} : vector<8x256xf32> to vector<8x64xf32>
    %171 = arith.negf %170 : vector<8x64xf32>
    %172 = math.exp %171 : vector<8x64xf32>
    %cst_42 = arith.constant 1.000000e+00 : f32
    %173 = vector.broadcast %cst_42 : f32 to vector<8x64xf32>
    %174 = arith.addf %173, %172 : vector<8x64xf32>
    %175 = arith.divf %173, %174 : vector<8x64xf32>
    %176 = vector.extract_strided_slice %169 {offsets = [0, 64], sizes = [8, 64], strides = [1, 1]} : vector<8x256xf32> to vector<8x64xf32>
    %177 = arith.negf %176 : vector<8x64xf32>
    %178 = math.exp %177 : vector<8x64xf32>
    %cst_43 = arith.constant 1.000000e+00 : f32
    %179 = vector.broadcast %cst_43 : f32 to vector<8x64xf32>
    %180 = arith.addf %179, %178 : vector<8x64xf32>
    %181 = arith.divf %179, %180 : vector<8x64xf32>
    %182 = vector.extract_strided_slice %169 {offsets = [0, 128], sizes = [8, 64], strides = [1, 1]} : vector<8x256xf32> to vector<8x64xf32>
    %183 = math.tanh %182 : vector<8x64xf32>
    %184 = vector.extract_strided_slice %169 {offsets = [0, 192], sizes = [8, 64], strides = [1, 1]} : vector<8x256xf32> to vector<8x64xf32>
    %185 = arith.negf %184 : vector<8x64xf32>
    %186 = math.exp %185 : vector<8x64xf32>
    %cst_44 = arith.constant 1.000000e+00 : f32
    %187 = vector.broadcast %cst_44 : f32 to vector<8x64xf32>
    %188 = arith.addf %187, %186 : vector<8x64xf32>
    %189 = arith.divf %187, %188 : vector<8x64xf32>
    %190 = arith.mulf %181, %130 : vector<8x64xf32>
    %191 = arith.mulf %175, %183 : vector<8x64xf32>
    %192 = arith.addf %190, %191 : vector<8x64xf32>
    %193 = math.tanh %192 : vector<8x64xf32>
    %194 = arith.mulf %189, %193 : vector<8x64xf32>
    %c3 = arith.constant 3 : index
    %c0_45 = arith.constant 0 : index
    %c0_46 = arith.constant 0 : index
    %195 = vector.load %arg1[%c3, %c0_45, %c0_46] : memref<8x8x256xf32, #tpu.memory_space<vmem>>, vector<1x8x256xf32>
    %196 = vector.shape_cast %195 : vector<1x8x256xf32> to vector<8x256xf32>
    %197 = arith.truncf %162 : vector<8x64xf32> to vector<8x64xbf16>
    %cst_47 = arith.constant dense<0.000000e+00> : vector<8x256xf32>
    %198 = tpu.matmul %197, %1, %cst_47 {dimension_numbers = #tpu.dot_dimension_numbers<[1], [0], [0], [1], [0, 0, 1, 1], [], []>} : vector<8x64xbf16>, vector<64x256xbf16>, vector<8x256xf32> -> vector<8x256xf32>
    %199 = arith.addf %196, %198 : vector<8x256xf32>
    %200 = vector.extract_strided_slice %199 {offsets = [0, 0], sizes = [8, 64], strides = [1, 1]} : vector<8x256xf32> to vector<8x64xf32>
    %201 = arith.negf %200 : vector<8x64xf32>
    %202 = math.exp %201 : vector<8x64xf32>
    %cst_48 = arith.constant 1.000000e+00 : f32
    %203 = vector.broadcast %cst_48 : f32 to vector<8x64xf32>
    %204 = arith.addf %203, %202 : vector<8x64xf32>
    %205 = arith.divf %203, %204 : vector<8x64xf32>
    %206 = vector.extract_strided_slice %199 {offsets = [0, 64], sizes = [8, 64], strides = [1, 1]} : vector<8x256xf32> to vector<8x64xf32>
    %207 = arith.negf %206 : vector<8x64xf32>
    %208 = math.exp %207 : vector<8x64xf32>
    %cst_49 = arith.constant 1.000000e+00 : f32
    %209 = vector.broadcast %cst_49 : f32 to vector<8x64xf32>
    %210 = arith.addf %209, %208 : vector<8x64xf32>
    %211 = arith.divf %209, %210 : vector<8x64xf32>
    %212 = vector.extract_strided_slice %199 {offsets = [0, 128], sizes = [8, 64], strides = [1, 1]} : vector<8x256xf32> to vector<8x64xf32>
    %213 = math.tanh %212 : vector<8x64xf32>
    %214 = vector.extract_strided_slice %199 {offsets = [0, 192], sizes = [8, 64], strides = [1, 1]} : vector<8x256xf32> to vector<8x64xf32>
    %215 = arith.negf %214 : vector<8x64xf32>
    %216 = math.exp %215 : vector<8x64xf32>
    %cst_50 = arith.constant 1.000000e+00 : f32
    %217 = vector.broadcast %cst_50 : f32 to vector<8x64xf32>
    %218 = arith.addf %217, %216 : vector<8x64xf32>
    %219 = arith.divf %217, %218 : vector<8x64xf32>
    %220 = arith.mulf %211, %160 : vector<8x64xf32>
    %221 = arith.mulf %205, %213 : vector<8x64xf32>
    %222 = arith.addf %220, %221 : vector<8x64xf32>
    %223 = math.tanh %222 : vector<8x64xf32>
    %224 = arith.mulf %219, %223 : vector<8x64xf32>
    %225 = arith.truncf %224 : vector<8x64xf32> to vector<8x64xbf16>
    %cst_51 = arith.constant dense<0.000000e+00> : vector<8x256xf32>
    %226 = tpu.matmul %225, %5, %cst_51 {dimension_numbers = #tpu.dot_dimension_numbers<[1], [0], [0], [1], [0, 0, 1, 1], [], []>} : vector<8x64xbf16>, vector<64x256xbf16>, vector<8x256xf32> -> vector<8x256xf32>
    %227 = arith.truncf %194 : vector<8x64xf32> to vector<8x64xbf16>
    %cst_52 = arith.constant dense<0.000000e+00> : vector<8x256xf32>
    %228 = tpu.matmul %227, %3, %cst_52 {dimension_numbers = #tpu.dot_dimension_numbers<[1], [0], [0], [1], [0, 0, 1, 1], [], []>} : vector<8x64xbf16>, vector<64x256xbf16>, vector<8x256xf32> -> vector<8x256xf32>
    %229 = arith.addf %226, %228 : vector<8x256xf32>
    %230 = vector.broadcast %7 : vector<1x256xf32> to vector<8x256xf32>
    %231 = arith.addf %229, %230 : vector<8x256xf32>
    %232 = vector.extract_strided_slice %231 {offsets = [0, 0], sizes = [8, 64], strides = [1, 1]} : vector<8x256xf32> to vector<8x64xf32>
    %233 = arith.negf %232 : vector<8x64xf32>
    %234 = math.exp %233 : vector<8x64xf32>
    %cst_53 = arith.constant 1.000000e+00 : f32
    %235 = vector.broadcast %cst_53 : f32 to vector<8x64xf32>
    %236 = arith.addf %235, %234 : vector<8x64xf32>
    %237 = arith.divf %235, %236 : vector<8x64xf32>
    %238 = vector.extract_strided_slice %231 {offsets = [0, 64], sizes = [8, 64], strides = [1, 1]} : vector<8x256xf32> to vector<8x64xf32>
    %239 = arith.negf %238 : vector<8x64xf32>
    %240 = math.exp %239 : vector<8x64xf32>
    %cst_54 = arith.constant 1.000000e+00 : f32
    %241 = vector.broadcast %cst_54 : f32 to vector<8x64xf32>
    %242 = arith.addf %241, %240 : vector<8x64xf32>
    %243 = arith.divf %241, %242 : vector<8x64xf32>
    %244 = vector.extract_strided_slice %231 {offsets = [0, 128], sizes = [8, 64], strides = [1, 1]} : vector<8x256xf32> to vector<8x64xf32>
    %245 = math.tanh %244 : vector<8x64xf32>
    %246 = vector.extract_strided_slice %231 {offsets = [0, 192], sizes = [8, 64], strides = [1, 1]} : vector<8x256xf32> to vector<8x64xf32>
    %247 = arith.negf %246 : vector<8x64xf32>
    %248 = math.exp %247 : vector<8x64xf32>
    %cst_55 = arith.constant 1.000000e+00 : f32
    %249 = vector.broadcast %cst_55 : f32 to vector<8x64xf32>
    %250 = arith.addf %249, %248 : vector<8x64xf32>
    %251 = arith.divf %249, %250 : vector<8x64xf32>
    %252 = arith.mulf %243, %192 : vector<8x64xf32>
    %253 = arith.mulf %237, %245 : vector<8x64xf32>
    %254 = arith.addf %252, %253 : vector<8x64xf32>
    %255 = math.tanh %254 : vector<8x64xf32>
    %256 = arith.mulf %251, %255 : vector<8x64xf32>
    %c4 = arith.constant 4 : index
    %c0_56 = arith.constant 0 : index
    %c0_57 = arith.constant 0 : index
    %257 = vector.load %arg1[%c4, %c0_56, %c0_57] : memref<8x8x256xf32, #tpu.memory_space<vmem>>, vector<1x8x256xf32>
    %258 = vector.shape_cast %257 : vector<1x8x256xf32> to vector<8x256xf32>
    %259 = arith.truncf %224 : vector<8x64xf32> to vector<8x64xbf16>
    %cst_58 = arith.constant dense<0.000000e+00> : vector<8x256xf32>
    %260 = tpu.matmul %259, %1, %cst_58 {dimension_numbers = #tpu.dot_dimension_numbers<[1], [0], [0], [1], [0, 0, 1, 1], [], []>} : vector<8x64xbf16>, vector<64x256xbf16>, vector<8x256xf32> -> vector<8x256xf32>
    %261 = arith.addf %258, %260 : vector<8x256xf32>
    %262 = vector.extract_strided_slice %261 {offsets = [0, 0], sizes = [8, 64], strides = [1, 1]} : vector<8x256xf32> to vector<8x64xf32>
    %263 = arith.negf %262 : vector<8x64xf32>
    %264 = math.exp %263 : vector<8x64xf32>
    %cst_59 = arith.constant 1.000000e+00 : f32
    %265 = vector.broadcast %cst_59 : f32 to vector<8x64xf32>
    %266 = arith.addf %265, %264 : vector<8x64xf32>
    %267 = arith.divf %265, %266 : vector<8x64xf32>
    %268 = vector.extract_strided_slice %261 {offsets = [0, 64], sizes = [8, 64], strides = [1, 1]} : vector<8x256xf32> to vector<8x64xf32>
    %269 = arith.negf %268 : vector<8x64xf32>
    %270 = math.exp %269 : vector<8x64xf32>
    %cst_60 = arith.constant 1.000000e+00 : f32
    %271 = vector.broadcast %cst_60 : f32 to vector<8x64xf32>
    %272 = arith.addf %271, %270 : vector<8x64xf32>
    %273 = arith.divf %271, %272 : vector<8x64xf32>
    %274 = vector.extract_strided_slice %261 {offsets = [0, 128], sizes = [8, 64], strides = [1, 1]} : vector<8x256xf32> to vector<8x64xf32>
    %275 = math.tanh %274 : vector<8x64xf32>
    %276 = vector.extract_strided_slice %261 {offsets = [0, 192], sizes = [8, 64], strides = [1, 1]} : vector<8x256xf32> to vector<8x64xf32>
    %277 = arith.negf %276 : vector<8x64xf32>
    %278 = math.exp %277 : vector<8x64xf32>
    %cst_61 = arith.constant 1.000000e+00 : f32
    %279 = vector.broadcast %cst_61 : f32 to vector<8x64xf32>
    %280 = arith.addf %279, %278 : vector<8x64xf32>
    %281 = arith.divf %279, %280 : vector<8x64xf32>
    %282 = arith.mulf %273, %222 : vector<8x64xf32>
    %283 = arith.mulf %267, %275 : vector<8x64xf32>
    %284 = arith.addf %282, %283 : vector<8x64xf32>
    %285 = math.tanh %284 : vector<8x64xf32>
    %286 = arith.mulf %281, %285 : vector<8x64xf32>
    %287 = arith.truncf %286 : vector<8x64xf32> to vector<8x64xbf16>
    %cst_62 = arith.constant dense<0.000000e+00> : vector<8x256xf32>
    %288 = tpu.matmul %287, %5, %cst_62 {dimension_numbers = #tpu.dot_dimension_numbers<[1], [0], [0], [1], [0, 0, 1, 1], [], []>} : vector<8x64xbf16>, vector<64x256xbf16>, vector<8x256xf32> -> vector<8x256xf32>
    %289 = arith.truncf %256 : vector<8x64xf32> to vector<8x64xbf16>
    %cst_63 = arith.constant dense<0.000000e+00> : vector<8x256xf32>
    %290 = tpu.matmul %289, %3, %cst_63 {dimension_numbers = #tpu.dot_dimension_numbers<[1], [0], [0], [1], [0, 0, 1, 1], [], []>} : vector<8x64xbf16>, vector<64x256xbf16>, vector<8x256xf32> -> vector<8x256xf32>
    %291 = arith.addf %288, %290 : vector<8x256xf32>
    %292 = vector.broadcast %7 : vector<1x256xf32> to vector<8x256xf32>
    %293 = arith.addf %291, %292 : vector<8x256xf32>
    %294 = vector.extract_strided_slice %293 {offsets = [0, 0], sizes = [8, 64], strides = [1, 1]} : vector<8x256xf32> to vector<8x64xf32>
    %295 = arith.negf %294 : vector<8x64xf32>
    %296 = math.exp %295 : vector<8x64xf32>
    %cst_64 = arith.constant 1.000000e+00 : f32
    %297 = vector.broadcast %cst_64 : f32 to vector<8x64xf32>
    %298 = arith.addf %297, %296 : vector<8x64xf32>
    %299 = arith.divf %297, %298 : vector<8x64xf32>
    %300 = vector.extract_strided_slice %293 {offsets = [0, 64], sizes = [8, 64], strides = [1, 1]} : vector<8x256xf32> to vector<8x64xf32>
    %301 = arith.negf %300 : vector<8x64xf32>
    %302 = math.exp %301 : vector<8x64xf32>
    %cst_65 = arith.constant 1.000000e+00 : f32
    %303 = vector.broadcast %cst_65 : f32 to vector<8x64xf32>
    %304 = arith.addf %303, %302 : vector<8x64xf32>
    %305 = arith.divf %303, %304 : vector<8x64xf32>
    %306 = vector.extract_strided_slice %293 {offsets = [0, 128], sizes = [8, 64], strides = [1, 1]} : vector<8x256xf32> to vector<8x64xf32>
    %307 = math.tanh %306 : vector<8x64xf32>
    %308 = vector.extract_strided_slice %293 {offsets = [0, 192], sizes = [8, 64], strides = [1, 1]} : vector<8x256xf32> to vector<8x64xf32>
    %309 = arith.negf %308 : vector<8x64xf32>
    %310 = math.exp %309 : vector<8x64xf32>
    %cst_66 = arith.constant 1.000000e+00 : f32
    %311 = vector.broadcast %cst_66 : f32 to vector<8x64xf32>
    %312 = arith.addf %311, %310 : vector<8x64xf32>
    %313 = arith.divf %311, %312 : vector<8x64xf32>
    %314 = arith.mulf %305, %254 : vector<8x64xf32>
    %315 = arith.mulf %299, %307 : vector<8x64xf32>
    %316 = arith.addf %314, %315 : vector<8x64xf32>
    %317 = math.tanh %316 : vector<8x64xf32>
    %318 = arith.mulf %313, %317 : vector<8x64xf32>
    %c5 = arith.constant 5 : index
    %c0_67 = arith.constant 0 : index
    %c0_68 = arith.constant 0 : index
    %319 = vector.load %arg1[%c5, %c0_67, %c0_68] : memref<8x8x256xf32, #tpu.memory_space<vmem>>, vector<1x8x256xf32>
    %320 = vector.shape_cast %319 : vector<1x8x256xf32> to vector<8x256xf32>
    %321 = arith.truncf %286 : vector<8x64xf32> to vector<8x64xbf16>
    %cst_69 = arith.constant dense<0.000000e+00> : vector<8x256xf32>
    %322 = tpu.matmul %321, %1, %cst_69 {dimension_numbers = #tpu.dot_dimension_numbers<[1], [0], [0], [1], [0, 0, 1, 1], [], []>} : vector<8x64xbf16>, vector<64x256xbf16>, vector<8x256xf32> -> vector<8x256xf32>
    %323 = arith.addf %320, %322 : vector<8x256xf32>
    %324 = vector.extract_strided_slice %323 {offsets = [0, 0], sizes = [8, 64], strides = [1, 1]} : vector<8x256xf32> to vector<8x64xf32>
    %325 = arith.negf %324 : vector<8x64xf32>
    %326 = math.exp %325 : vector<8x64xf32>
    %cst_70 = arith.constant 1.000000e+00 : f32
    %327 = vector.broadcast %cst_70 : f32 to vector<8x64xf32>
    %328 = arith.addf %327, %326 : vector<8x64xf32>
    %329 = arith.divf %327, %328 : vector<8x64xf32>
    %330 = vector.extract_strided_slice %323 {offsets = [0, 64], sizes = [8, 64], strides = [1, 1]} : vector<8x256xf32> to vector<8x64xf32>
    %331 = arith.negf %330 : vector<8x64xf32>
    %332 = math.exp %331 : vector<8x64xf32>
    %cst_71 = arith.constant 1.000000e+00 : f32
    %333 = vector.broadcast %cst_71 : f32 to vector<8x64xf32>
    %334 = arith.addf %333, %332 : vector<8x64xf32>
    %335 = arith.divf %333, %334 : vector<8x64xf32>
    %336 = vector.extract_strided_slice %323 {offsets = [0, 128], sizes = [8, 64], strides = [1, 1]} : vector<8x256xf32> to vector<8x64xf32>
    %337 = math.tanh %336 : vector<8x64xf32>
    %338 = vector.extract_strided_slice %323 {offsets = [0, 192], sizes = [8, 64], strides = [1, 1]} : vector<8x256xf32> to vector<8x64xf32>
    %339 = arith.negf %338 : vector<8x64xf32>
    %340 = math.exp %339 : vector<8x64xf32>
    %cst_72 = arith.constant 1.000000e+00 : f32
    %341 = vector.broadcast %cst_72 : f32 to vector<8x64xf32>
    %342 = arith.addf %341, %340 : vector<8x64xf32>
    %343 = arith.divf %341, %342 : vector<8x64xf32>
    %344 = arith.mulf %335, %284 : vector<8x64xf32>
    %345 = arith.mulf %329, %337 : vector<8x64xf32>
    %346 = arith.addf %344, %345 : vector<8x64xf32>
    %347 = math.tanh %346 : vector<8x64xf32>
    %348 = arith.mulf %343, %347 : vector<8x64xf32>
    %349 = arith.truncf %348 : vector<8x64xf32> to vector<8x64xbf16>
    %cst_73 = arith.constant dense<0.000000e+00> : vector<8x256xf32>
    %350 = tpu.matmul %349, %5, %cst_73 {dimension_numbers = #tpu.dot_dimension_numbers<[1], [0], [0], [1], [0, 0, 1, 1], [], []>} : vector<8x64xbf16>, vector<64x256xbf16>, vector<8x256xf32> -> vector<8x256xf32>
    %351 = arith.truncf %318 : vector<8x64xf32> to vector<8x64xbf16>
    %cst_74 = arith.constant dense<0.000000e+00> : vector<8x256xf32>
    %352 = tpu.matmul %351, %3, %cst_74 {dimension_numbers = #tpu.dot_dimension_numbers<[1], [0], [0], [1], [0, 0, 1, 1], [], []>} : vector<8x64xbf16>, vector<64x256xbf16>, vector<8x256xf32> -> vector<8x256xf32>
    %353 = arith.addf %350, %352 : vector<8x256xf32>
    %354 = vector.broadcast %7 : vector<1x256xf32> to vector<8x256xf32>
    %355 = arith.addf %353, %354 : vector<8x256xf32>
    %356 = vector.extract_strided_slice %355 {offsets = [0, 0], sizes = [8, 64], strides = [1, 1]} : vector<8x256xf32> to vector<8x64xf32>
    %357 = arith.negf %356 : vector<8x64xf32>
    %358 = math.exp %357 : vector<8x64xf32>
    %cst_75 = arith.constant 1.000000e+00 : f32
    %359 = vector.broadcast %cst_75 : f32 to vector<8x64xf32>
    %360 = arith.addf %359, %358 : vector<8x64xf32>
    %361 = arith.divf %359, %360 : vector<8x64xf32>
    %362 = vector.extract_strided_slice %355 {offsets = [0, 64], sizes = [8, 64], strides = [1, 1]} : vector<8x256xf32> to vector<8x64xf32>
    %363 = arith.negf %362 : vector<8x64xf32>
    %364 = math.exp %363 : vector<8x64xf32>
    %cst_76 = arith.constant 1.000000e+00 : f32
    %365 = vector.broadcast %cst_76 : f32 to vector<8x64xf32>
    %366 = arith.addf %365, %364 : vector<8x64xf32>
    %367 = arith.divf %365, %366 : vector<8x64xf32>
    %368 = vector.extract_strided_slice %355 {offsets = [0, 128], sizes = [8, 64], strides = [1, 1]} : vector<8x256xf32> to vector<8x64xf32>
    %369 = math.tanh %368 : vector<8x64xf32>
    %370 = vector.extract_strided_slice %355 {offsets = [0, 192], sizes = [8, 64], strides = [1, 1]} : vector<8x256xf32> to vector<8x64xf32>
    %371 = arith.negf %370 : vector<8x64xf32>
    %372 = math.exp %371 : vector<8x64xf32>
    %cst_77 = arith.constant 1.000000e+00 : f32
    %373 = vector.broadcast %cst_77 : f32 to vector<8x64xf32>
    %374 = arith.addf %373, %372 : vector<8x64xf32>
    %375 = arith.divf %373, %374 : vector<8x64xf32>
    %376 = arith.mulf %367, %316 : vector<8x64xf32>
    %377 = arith.mulf %361, %369 : vector<8x64xf32>
    %378 = arith.addf %376, %377 : vector<8x64xf32>
    %379 = math.tanh %378 : vector<8x64xf32>
    %380 = arith.mulf %375, %379 : vector<8x64xf32>
    %c6 = arith.constant 6 : index
    %c0_78 = arith.constant 0 : index
    %c0_79 = arith.constant 0 : index
    %381 = vector.load %arg1[%c6, %c0_78, %c0_79] : memref<8x8x256xf32, #tpu.memory_space<vmem>>, vector<1x8x256xf32>
    %382 = vector.shape_cast %381 : vector<1x8x256xf32> to vector<8x256xf32>
    %383 = arith.truncf %348 : vector<8x64xf32> to vector<8x64xbf16>
    %cst_80 = arith.constant dense<0.000000e+00> : vector<8x256xf32>
    %384 = tpu.matmul %383, %1, %cst_80 {dimension_numbers = #tpu.dot_dimension_numbers<[1], [0], [0], [1], [0, 0, 1, 1], [], []>} : vector<8x64xbf16>, vector<64x256xbf16>, vector<8x256xf32> -> vector<8x256xf32>
    %385 = arith.addf %382, %384 : vector<8x256xf32>
    %386 = vector.extract_strided_slice %385 {offsets = [0, 0], sizes = [8, 64], strides = [1, 1]} : vector<8x256xf32> to vector<8x64xf32>
    %387 = arith.negf %386 : vector<8x64xf32>
    %388 = math.exp %387 : vector<8x64xf32>
    %cst_81 = arith.constant 1.000000e+00 : f32
    %389 = vector.broadcast %cst_81 : f32 to vector<8x64xf32>
    %390 = arith.addf %389, %388 : vector<8x64xf32>
    %391 = arith.divf %389, %390 : vector<8x64xf32>
    %392 = vector.extract_strided_slice %385 {offsets = [0, 64], sizes = [8, 64], strides = [1, 1]} : vector<8x256xf32> to vector<8x64xf32>
    %393 = arith.negf %392 : vector<8x64xf32>
    %394 = math.exp %393 : vector<8x64xf32>
    %cst_82 = arith.constant 1.000000e+00 : f32
    %395 = vector.broadcast %cst_82 : f32 to vector<8x64xf32>
    %396 = arith.addf %395, %394 : vector<8x64xf32>
    %397 = arith.divf %395, %396 : vector<8x64xf32>
    %398 = vector.extract_strided_slice %385 {offsets = [0, 128], sizes = [8, 64], strides = [1, 1]} : vector<8x256xf32> to vector<8x64xf32>
    %399 = math.tanh %398 : vector<8x64xf32>
    %400 = vector.extract_strided_slice %385 {offsets = [0, 192], sizes = [8, 64], strides = [1, 1]} : vector<8x256xf32> to vector<8x64xf32>
    %401 = arith.negf %400 : vector<8x64xf32>
    %402 = math.exp %401 : vector<8x64xf32>
    %cst_83 = arith.constant 1.000000e+00 : f32
    %403 = vector.broadcast %cst_83 : f32 to vector<8x64xf32>
    %404 = arith.addf %403, %402 : vector<8x64xf32>
    %405 = arith.divf %403, %404 : vector<8x64xf32>
    %406 = arith.mulf %397, %346 : vector<8x64xf32>
    %407 = arith.mulf %391, %399 : vector<8x64xf32>
    %408 = arith.addf %406, %407 : vector<8x64xf32>
    %409 = math.tanh %408 : vector<8x64xf32>
    %410 = arith.mulf %405, %409 : vector<8x64xf32>
    %411 = arith.truncf %410 : vector<8x64xf32> to vector<8x64xbf16>
    %cst_84 = arith.constant dense<0.000000e+00> : vector<8x256xf32>
    %412 = tpu.matmul %411, %5, %cst_84 {dimension_numbers = #tpu.dot_dimension_numbers<[1], [0], [0], [1], [0, 0, 1, 1], [], []>} : vector<8x64xbf16>, vector<64x256xbf16>, vector<8x256xf32> -> vector<8x256xf32>
    %413 = arith.truncf %380 : vector<8x64xf32> to vector<8x64xbf16>
    %cst_85 = arith.constant dense<0.000000e+00> : vector<8x256xf32>
    %414 = tpu.matmul %413, %3, %cst_85 {dimension_numbers = #tpu.dot_dimension_numbers<[1], [0], [0], [1], [0, 0, 1, 1], [], []>} : vector<8x64xbf16>, vector<64x256xbf16>, vector<8x256xf32> -> vector<8x256xf32>
    %415 = arith.addf %412, %414 : vector<8x256xf32>
    %416 = vector.broadcast %7 : vector<1x256xf32> to vector<8x256xf32>
    %417 = arith.addf %415, %416 : vector<8x256xf32>
    %418 = vector.extract_strided_slice %417 {offsets = [0, 0], sizes = [8, 64], strides = [1, 1]} : vector<8x256xf32> to vector<8x64xf32>
    %419 = arith.negf %418 : vector<8x64xf32>
    %420 = math.exp %419 : vector<8x64xf32>
    %cst_86 = arith.constant 1.000000e+00 : f32
    %421 = vector.broadcast %cst_86 : f32 to vector<8x64xf32>
    %422 = arith.addf %421, %420 : vector<8x64xf32>
    %423 = arith.divf %421, %422 : vector<8x64xf32>
    %424 = vector.extract_strided_slice %417 {offsets = [0, 64], sizes = [8, 64], strides = [1, 1]} : vector<8x256xf32> to vector<8x64xf32>
    %425 = arith.negf %424 : vector<8x64xf32>
    %426 = math.exp %425 : vector<8x64xf32>
    %cst_87 = arith.constant 1.000000e+00 : f32
    %427 = vector.broadcast %cst_87 : f32 to vector<8x64xf32>
    %428 = arith.addf %427, %426 : vector<8x64xf32>
    %429 = arith.divf %427, %428 : vector<8x64xf32>
    %430 = vector.extract_strided_slice %417 {offsets = [0, 128], sizes = [8, 64], strides = [1, 1]} : vector<8x256xf32> to vector<8x64xf32>
    %431 = math.tanh %430 : vector<8x64xf32>
    %432 = vector.extract_strided_slice %417 {offsets = [0, 192], sizes = [8, 64], strides = [1, 1]} : vector<8x256xf32> to vector<8x64xf32>
    %433 = arith.negf %432 : vector<8x64xf32>
    %434 = math.exp %433 : vector<8x64xf32>
    %cst_88 = arith.constant 1.000000e+00 : f32
    %435 = vector.broadcast %cst_88 : f32 to vector<8x64xf32>
    %436 = arith.addf %435, %434 : vector<8x64xf32>
    %437 = arith.divf %435, %436 : vector<8x64xf32>
    %438 = arith.mulf %429, %378 : vector<8x64xf32>
    %439 = arith.mulf %423, %431 : vector<8x64xf32>
    %440 = arith.addf %438, %439 : vector<8x64xf32>
    %441 = math.tanh %440 : vector<8x64xf32>
    %442 = arith.mulf %437, %441 : vector<8x64xf32>
    %c7 = arith.constant 7 : index
    %c0_89 = arith.constant 0 : index
    %c0_90 = arith.constant 0 : index
    %443 = vector.load %arg1[%c7, %c0_89, %c0_90] : memref<8x8x256xf32, #tpu.memory_space<vmem>>, vector<1x8x256xf32>
    %444 = vector.shape_cast %443 : vector<1x8x256xf32> to vector<8x256xf32>
    %445 = arith.truncf %410 : vector<8x64xf32> to vector<8x64xbf16>
    %cst_91 = arith.constant dense<0.000000e+00> : vector<8x256xf32>
    %446 = tpu.matmul %445, %1, %cst_91 {dimension_numbers = #tpu.dot_dimension_numbers<[1], [0], [0], [1], [0, 0, 1, 1], [], []>} : vector<8x64xbf16>, vector<64x256xbf16>, vector<8x256xf32> -> vector<8x256xf32>
    %447 = arith.addf %444, %446 : vector<8x256xf32>
    %448 = vector.extract_strided_slice %447 {offsets = [0, 0], sizes = [8, 64], strides = [1, 1]} : vector<8x256xf32> to vector<8x64xf32>
    %449 = arith.negf %448 : vector<8x64xf32>
    %450 = math.exp %449 : vector<8x64xf32>
    %cst_92 = arith.constant 1.000000e+00 : f32
    %451 = vector.broadcast %cst_92 : f32 to vector<8x64xf32>
    %452 = arith.addf %451, %450 : vector<8x64xf32>
    %453 = arith.divf %451, %452 : vector<8x64xf32>
    %454 = vector.extract_strided_slice %447 {offsets = [0, 64], sizes = [8, 64], strides = [1, 1]} : vector<8x256xf32> to vector<8x64xf32>
    %455 = arith.negf %454 : vector<8x64xf32>
    %456 = math.exp %455 : vector<8x64xf32>
    %cst_93 = arith.constant 1.000000e+00 : f32
    %457 = vector.broadcast %cst_93 : f32 to vector<8x64xf32>
    %458 = arith.addf %457, %456 : vector<8x64xf32>
    %459 = arith.divf %457, %458 : vector<8x64xf32>
    %460 = vector.extract_strided_slice %447 {offsets = [0, 128], sizes = [8, 64], strides = [1, 1]} : vector<8x256xf32> to vector<8x64xf32>
    %461 = math.tanh %460 : vector<8x64xf32>
    %462 = vector.extract_strided_slice %447 {offsets = [0, 192], sizes = [8, 64], strides = [1, 1]} : vector<8x256xf32> to vector<8x64xf32>
    %463 = arith.negf %462 : vector<8x64xf32>
    %464 = math.exp %463 : vector<8x64xf32>
    %cst_94 = arith.constant 1.000000e+00 : f32
    %465 = vector.broadcast %cst_94 : f32 to vector<8x64xf32>
    %466 = arith.addf %465, %464 : vector<8x64xf32>
    %467 = arith.divf %465, %466 : vector<8x64xf32>
    %468 = arith.mulf %459, %408 : vector<8x64xf32>
    %469 = arith.mulf %453, %461 : vector<8x64xf32>
    %470 = arith.addf %468, %469 : vector<8x64xf32>
    %471 = math.tanh %470 : vector<8x64xf32>
    %472 = arith.mulf %467, %471 : vector<8x64xf32>
    %473 = arith.truncf %472 : vector<8x64xf32> to vector<8x64xbf16>
    %cst_95 = arith.constant dense<0.000000e+00> : vector<8x256xf32>
    %474 = tpu.matmul %473, %5, %cst_95 {dimension_numbers = #tpu.dot_dimension_numbers<[1], [0], [0], [1], [0, 0, 1, 1], [], []>} : vector<8x64xbf16>, vector<64x256xbf16>, vector<8x256xf32> -> vector<8x256xf32>
    %475 = arith.truncf %442 : vector<8x64xf32> to vector<8x64xbf16>
    %cst_96 = arith.constant dense<0.000000e+00> : vector<8x256xf32>
    %476 = tpu.matmul %475, %3, %cst_96 {dimension_numbers = #tpu.dot_dimension_numbers<[1], [0], [0], [1], [0, 0, 1, 1], [], []>} : vector<8x64xbf16>, vector<64x256xbf16>, vector<8x256xf32> -> vector<8x256xf32>
    %477 = arith.addf %474, %476 : vector<8x256xf32>
    %478 = vector.broadcast %7 : vector<1x256xf32> to vector<8x256xf32>
    %479 = arith.addf %477, %478 : vector<8x256xf32>
    %480 = vector.extract_strided_slice %479 {offsets = [0, 0], sizes = [8, 64], strides = [1, 1]} : vector<8x256xf32> to vector<8x64xf32>
    %481 = arith.negf %480 : vector<8x64xf32>
    %482 = math.exp %481 : vector<8x64xf32>
    %cst_97 = arith.constant 1.000000e+00 : f32
    %483 = vector.broadcast %cst_97 : f32 to vector<8x64xf32>
    %484 = arith.addf %483, %482 : vector<8x64xf32>
    %485 = arith.divf %483, %484 : vector<8x64xf32>
    %486 = vector.extract_strided_slice %479 {offsets = [0, 64], sizes = [8, 64], strides = [1, 1]} : vector<8x256xf32> to vector<8x64xf32>
    %487 = arith.negf %486 : vector<8x64xf32>
    %488 = math.exp %487 : vector<8x64xf32>
    %cst_98 = arith.constant 1.000000e+00 : f32
    %489 = vector.broadcast %cst_98 : f32 to vector<8x64xf32>
    %490 = arith.addf %489, %488 : vector<8x64xf32>
    %491 = arith.divf %489, %490 : vector<8x64xf32>
    %492 = vector.extract_strided_slice %479 {offsets = [0, 128], sizes = [8, 64], strides = [1, 1]} : vector<8x256xf32> to vector<8x64xf32>
    %493 = math.tanh %492 : vector<8x64xf32>
    %494 = vector.extract_strided_slice %479 {offsets = [0, 192], sizes = [8, 64], strides = [1, 1]} : vector<8x256xf32> to vector<8x64xf32>
    %495 = arith.negf %494 : vector<8x64xf32>
    %496 = math.exp %495 : vector<8x64xf32>
    %cst_99 = arith.constant 1.000000e+00 : f32
    %497 = vector.broadcast %cst_99 : f32 to vector<8x64xf32>
    %498 = arith.addf %497, %496 : vector<8x64xf32>
    %499 = arith.divf %497, %498 : vector<8x64xf32>
    %500 = arith.mulf %491, %440 : vector<8x64xf32>
    %501 = arith.mulf %485, %493 : vector<8x64xf32>
    %502 = arith.addf %500, %501 : vector<8x64xf32>
    %503 = math.tanh %502 : vector<8x64xf32>
    %504 = arith.mulf %499, %503 : vector<8x64xf32>
    %c0_100 = arith.constant 0 : index
    %c0_101 = arith.constant 0 : index
    %505 = vector.load %arg5[%c0_100, %c0_101] : memref<8x64xf32, #tpu.memory_space<vmem>>, vector<8x64xf32>
    tpu.vector_store %arg5[%c0_100, %c0_101], %504 {strides = array<i32>} : memref<8x64xf32, #tpu.memory_space<vmem>>, vector<8x64xf32>,
    return
  }
  func.func @transform_0(%arg0: i32) -> (i32, i32, i32) {
    %c0_i32 = arith.constant 0 : i32
    %c0_i32_0 = arith.constant 0 : i32
    %c0_i32_1 = arith.constant 0 : i32
    %c0_i32_2 = arith.constant 0 : i32
    return %c0_i32, %c0_i32_0, %c0_i32_1 : i32, i32, i32
  }
  func.func @transform_1(%arg0: i32) -> (i32, i32, i32) {
    %c0_i32 = arith.constant 0 : i32
    %c0_i32_0 = arith.constant 0 : i32
    %c0_i32_1 = arith.constant 0 : i32
    %c0_i32_2 = arith.constant 0 : i32
    return %c0_i32, %c0_i32_0, %c0_i32_1 : i32, i32, i32
  }
  func.func @transform_2(%arg0: i32) -> (i32, i32, i32) {
    %c0_i32 = arith.constant 0 : i32
    %c0_i32_0 = arith.constant 0 : i32
    %c0_i32_1 = arith.constant 0 : i32
    %c0_i32_2 = arith.constant 0 : i32
    return %c0_i32, %c0_i32_0, %c0_i32_1 : i32, i32, i32
  }
  func.func @transform_3(%arg0: i32) -> (i32, i32, i32) {
    %c0_i32 = arith.constant 0 : i32
    %c0_i32_0 = arith.constant 0 : i32
    %c0_i32_1 = arith.constant 0 : i32
    %c0_i32_2 = arith.constant 0 : i32
    return %c0_i32, %c0_i32_0, %c0_i32_1 : i32, i32, i32
  }
  func.func @transform_4(%arg0: i32) -> (i32, i32) {
    %c0_i32 = arith.constant 0 : i32
    %c0_i32_0 = arith.constant 0 : i32
    %c0_i32_1 = arith.constant 0 : i32
    return %c0_i32, %c0_i32_0 : i32, i32
  }
}

</mosaic_0001>

<bundles_post_ra>
// kernel: text_lstm_forward.1
= control target key start
LH: loop header
LB: loop body
LE: loop exit
PB: predicated region body
PF: predicated region fallthrough
CT: control target
= control target key end

     0   :  { %v2038_v1 = vmov 0   ;;  %s2039_s9 = smov 64   ;;  %vm86_vm0 = vcmask 523264   ;;  %v325_v54 = vlaneseq  ;;  %s2701_s1 = inlined_call_operand.vmem [shape: bf16[2,64,256], index: 1, kind: input, shape index: {}]   ;;  %s2702_s0 = inlined_call_operand.vmem [shape: f32[8,8,256], index: 0, kind: input, shape index: {}]   ;;  %s2703_s2 = inlined_call_operand.vmem [shape: bf16[1,64,256], index: 2, kind: input, shape index: {}]   ;;  %s2704_s3 = inlined_call_operand.vmem [shape: f32[1,1,256], index: 3, kind: input, shape index: {}]   ;;  %s2705_s4 = inlined_call_operand.vmem [shape: f32[8,64], index: 4, kind: output, shape index: {}]  }
   0x1   :  { %v2068_v0 = vld [vmem:[%s2701_s1 + $0x4] ss:$8 sps:$4 sm:$0xff]   ;;  %122 = vmatprep.mubr.bf16.mxu0 %v2038_v1  ;;  %228 = vmatprep.mubr.bf16.mxu1 %v2038_v1  ;;  %v2075_v2 = vld [vmem:[%s2701_s1] ss:$8 sps:$4 sm:$0xff]   ;;  %v2081_v3 = vld [vmem:[%s2701_s1 + $0x14] ss:$8 sps:$4 sm:$0xff]  }
   0x2   :  { %90 = vmatprep.subr.bf16.mxu0 %v2068_v0  ;;  %v2087_v4 = vld [vmem:[%s2701_s1 + $0x10] ss:$8 sps:$4 sm:$0xff]   ;;  %v2093_v5 = vld [vmem:[%s2701_s1 + $0x24] ss:$8 sps:$4 sm:$0xff]   ;;  %v2098_v6 = vld [vmem:[%s2701_s1 + $0x20] ss:$8 sps:$4 sm:$0xff]  }
   0x3   :  { %91 = vmatpush1.bf16.msra.mxu0 %v2075_v2  ;;  %v2105_v7 = vld [vmem:[%s2701_s1 + $0x34] ss:$8 sps:$4 sm:$0xff]   ;;  %v2111_v8 = vld [vmem:[%s2701_s1 + $0x30] ss:$8 sps:$4 sm:$0xff]   ;;  %v44_v9 = vld [vmem:[%s2702_s0] sm:$0xff]  ;;  %v326_v55 = vshrl.u32 %v325_v54, 7 }
   0x4   :  { %92 = vmatprep.subr.bf16.mxu0 %v2081_v3  ;;  %v45_v16 = vld [vmem:[%s2702_s0 + $0x8] sm:$0xff]  ;;  %v2137_v25 = vld [vmem:[%s2701_s1 + $0x54] ss:$8 sps:$4 sm:$0xff]   ;;  %v2143_v26 = vld [vmem:[%s2701_s1 + $0x50] ss:$8 sps:$4 sm:$0xff]  }
   0x5   :  { %v2127_v23 = vld [vmem:[%s2701_s1 + $0x44] ss:$8 sps:$4 sm:$0xff]   ;;  %v2132_v24 = vld [vmem:[%s2701_s1 + $0x40] ss:$8 sps:$4 sm:$0xff]   ;;  %v2165_v30 = vld [vmem:[%s2703_s2 + $0x14] ss:$8 sps:$4 sm:$0xff]  }
   0x6   :  { %196 = vmatprep.subr.bf16.mxu1 %v2127_v23  ;;  %v2148_v27 = vld [vmem:[%s2701_s1 + $0x64] ss:$8 sps:$4 sm:$0xff]   ;;  %v2159_v29 = vld [vmem:[%s2703_s2] ss:$8 sps:$4 sm:$0xff]   ;;  %v2172_v31 = vld [vmem:[%s2703_s2 + $0x10] ss:$8 sps:$4 sm:$0xff]  }
   0x7   :  { %93 = vmatpush1.bf16.msra.mxu0 %v2087_v4  ;;  %197 = vmatpush1.bf16.msra.mxu1 %v2132_v24  ;;  %v2154_v28 = vld [vmem:[%s2703_s2 + $0x4] ss:$8 sps:$4 sm:$0xff]   ;;  %v2178_v32 = vld [vmem:[%s2701_s1 + $0x60] ss:$8 sps:$4 sm:$0xff]   ;;  %v2190_v34 = vld [vmem:[%s2701_s1 + $0x74] ss:$8 sps:$4 sm:$0xff]  }
   0x8   :  { %94 = vmatprep.subr.bf16.mxu0 %v2093_v5  ;;  %198 = vmatprep.subr.bf16.mxu1 %v2137_v25  ;;  %v2184_v33 = vld [vmem:[%s2703_s2 + $0x24] ss:$8 sps:$4 sm:$0xff]   ;;  %v2196_v35 = vld [vmem:[%s2703_s2 + $0x20] ss:$8 sps:$4 sm:$0xff]   ;;  %v2202_v36 = vld [vmem:[%s2701_s1 + $0x70] ss:$8 sps:$4 sm:$0xff]  }
   0x9   :  { %v2208_v37 = vld [vmem:[%s2703_s2 + $0x34] ss:$8 sps:$4 sm:$0xff]   ;;  %v2215_v38 = vld [vmem:[%s2703_s2 + $0x30] ss:$8 sps:$4 sm:$0xff]   ;;  %v327_v56 = vsub.s32 0, %v326_v55 }
   0xa   :  { %v43_v57 = vld [vmem:[%s2704_s3] sm:$0x3]  ;;  %v1721_v58 = vld [vmem:[%s2702_s0 + $0x10] sm:$0xff] }
   0xb   :  { %95 = vmatpush1.bf16.msra.mxu0 %v2098_v6  ;;  %199 = vmatpush1.bf16.msra.mxu1 %v2143_v26  ;;  %v2262_v59 = vrot.slane %v43_v57, %v327_v56 }
   0xc   :  { %96 = vmatprep.subr.bf16.mxu0 %v2105_v7  ;;  %200 = vmatprep.subr.bf16.mxu1 %v2148_v27 }
   0xf   :  { %97 = vmatpush1.bf16.msra.mxu0 %v2111_v8  ;;  %201 = vmatpush1.bf16.msra.mxu1 %v2178_v32 }
  0x10   :  { %283 = vmatprep.subr.bf16.mxu0 %v2154_v28  ;;  %202 = vmatprep.subr.bf16.mxu1 %v2190_v34 }
  0x12   :  { %123 = vmatmul.mubr.bf16.vlgmr.msra.gmra.mrb[0].mxu0 %v2038_v1 }
  0x13   :  { %315 = vmatprep.mubr.bf16.mxu0 %v2038_v1  ;;  %284 = vmatpush1.bf16.msra.mxu0 %v2159_v29 }
  0x14   :  { %285 = vmatprep.subr.bf16.mxu0 %v2165_v30  ;;  %203 = vmatpush1.bf16.msra.mxu1 %v2202_v36 }
  0x15   :  { %362 = vmatprep.subr.bf16.mxu1 %v2068_v0 }
  0x17   :  { %286 = vmatpush1.bf16.msra.mxu0 %v2172_v31  ;;  %229 = vmatmul.mubr.bf16.vlgmr.msra.gmra.mrb[0].mxu1 %v2038_v1 }
  0x18   :  { %287 = vmatprep.subr.bf16.mxu0 %v2184_v33  ;;  %363 = vmatpush1.bf16.msra.mxu1 %v2075_v2 }
  0x19   :  { %394 = vmatprep.mubr.bf16.mxu1 %v2038_v1  ;;  %364 = vmatprep.subr.bf16.mxu1 %v2081_v3 }
  0x1b   :  { %288 = vmatpush1.bf16.msra.mxu0 %v2196_v35 }
  0x1c   :  { %289 = vmatprep.subr.bf16.mxu0 %v2208_v37  ;;  %365 = vmatpush1.bf16.msra.mxu1 %v2087_v4 }
  0x1d   :  { %366 = vmatprep.subr.bf16.mxu1 %v2093_v5 }
  0x1f   :  { %290 = vmatpush1.bf16.msra.mxu0 %v2215_v38 }
  0x20   :  { %435 = vmatprep.subr.bf16.mxu0 %v2127_v23  ;;  %367 = vmatpush1.bf16.msra.mxu1 %v2098_v6 }
  0x21   :  { %368 = vmatprep.subr.bf16.mxu1 %v2105_v7 }
  0x24   :  { %369 = vmatpush1.bf16.msra.mxu1 %v2111_v8 }
  0x25   :  { %482 = vmatprep.subr.bf16.mxu1 %v2154_v28 }
  0xe5   :  { %v124_v10 = vpop.f32.mrb[0].mxu0 }
  0xe6   :  { %v131_v11 = vadd.f32 %v124_v10, %v44_v9  ;;  %v126_v12 = vpop.f32.mrb[1].mxu0 }
  0xe7   :  { %v128_v13 = vpop.f32.mrb[2].mxu0  ;;  %v132_v17 = vadd.f32 %v126_v12, %v45_v16 }
  0xe8   :  { %v1700_v14 = vmul.f32 -1.442695, %v131_v11  ;;  %v129_v15 = vpop.f32.mrb[3].mxu0 }
  0xe9   :  { %v1701_v39 = vmul.f32 -1.442695, %v132_v17 }
  0xea   :  { %1822 = vpow2.f32 %v1700_v14  ;;  %v230_v49 = vpop.f32.mrb[0].mxu1 }
  0xeb   :  { %1824 = vtanh.f32 %v132_v17  ;;  %v232_v50 = vpop.f32.mrb[1].mxu1 }
  0xec   :  { %v234_v51 = vpop.f32.mrb[2].mxu1 }
  0xed   :  { %v235_v52 = vpop.f32.mrb[3].mxu1 }
  0xf4   :  { %v1823_v18 = vpop.eup %1822 }
  0xf5   :  { %v136_v19 = vadd.f32 1.0, %v1823_v18  ;;  %v1825_v20 = vpop.eup %1824 }
  0xf7   :  { %1826 = vrcp.f32 %v136_v19  ;;  %v331_v19 = vsub.s32 1, %v326_v55 }
  0xf8   :  { %1828 = vpow2.f32 %v1701_v39 }
 0x101   :  { %v1827_v21 = vpop.eup %1826 }
 0x102   :  { %v147_v22 = vmul.f32 %v1827_v21, %v1825_v20  ;;  %v1829_v40 = vpop.eup %1828  ;;  %v146_v42 = vmul.f32 0.0, %v1827_v21  ;;  %v1722_v20 = vld [vmem:[%s2702_s0 + $0x18] sm:$0xff]  ;;  %v2268_v21 = vrot.slane %v43_v57, %v331_v19 }
 0x103   :  { %v143_v41 = vadd.f32 1.0, %v1829_v40 }
 0x104   :  { %149 = vrot.lane.b32.xlu0 %v147_v22, %s2039_s9 }
 0x105   :  { %1830 = vrcp.f32 %v143_v41 }
 0x10f   :  { %v1831_v45 = vpop.eup %1830 }
 0x176   :  { %v150_v43 = vpop.permute.xlu0 %149 }
 0x177   :  { %v2232_v44 = vadd.f32 %v150_v43, %v146_v42 }
 0x179   :  { %1832 = vtanh.f32 %v2232_v44 }
 0x183   :  { %v1833_v46 = vpop.eup %1832 }
 0x184   :  { %v154_v47 = vmul.f32 %v1833_v46, %v1831_v45 }
 0x186   :  { %v155_v48 = vpack.c.bf16 %v154_v47, %v154_v47 }
 0x188   :  { %238 = vrot.lane.b32.xlu0 %v155_v48, %s2039_s9 }
 0x1fa   :  { %v239_v53 = vpop.permute.xlu0 %238 }
 0x1fb   :  { %1718 = vmatmul.mubr.msk.bf16.vlgmr.msra.gmra.mrb[4].mxu0 %vm86_vm0, %v239_v53  ;;  %1723 = vmatmul.mubr.msk.bf16.vlgmr.msra.gmra.mrb[4].mxu1 %vm86_vm0, %v239_v53 }
 0x1fc   :  { %436 = vmatpush1.bf16.msra.mxu0 %v2132_v24  ;;  %483 = vmatpush1.bf16.msra.mxu1 %v2159_v29 }
 0x1fd   :  { %437 = vmatprep.subr.bf16.mxu0 %v2137_v25  ;;  %484 = vmatprep.subr.bf16.mxu1 %v2165_v30 }
 0x1fe   :  { %467 = vmatprep.mubr.bf16.mxu0 %v2038_v1  ;;  %514 = vmatprep.mubr.bf16.mxu1 %v2038_v1 }
 0x200   :  { %438 = vmatpush1.bf16.msra.mxu0 %v2143_v26  ;;  %485 = vmatpush1.bf16.msra.mxu1 %v2172_v31 }
 0x201   :  { %439 = vmatprep.subr.bf16.mxu0 %v2148_v27  ;;  %486 = vmatprep.subr.bf16.mxu1 %v2184_v33 }
 0x204   :  { %440 = vmatpush1.bf16.msra.mxu0 %v2178_v32  ;;  %487 = vmatpush1.bf16.msra.mxu1 %v2196_v35 }
 0x205   :  { %441 = vmatprep.subr.bf16.mxu0 %v2190_v34  ;;  %488 = vmatprep.subr.bf16.mxu1 %v2208_v37 }
 0x208   :  { %442 = vmatpush1.bf16.msra.mxu0 %v2202_v36  ;;  %489 = vmatpush1.bf16.msra.mxu1 %v2215_v38 }
 0x209   :  { %550 = vmatprep.subr.bf16.mxu0 %v2068_v0  ;;  %623 = vmatprep.subr.bf16.mxu1 %v2127_v23 }
 0x2ce   :  { %v317_v60 = vpop.f32.mrb[4].mxu0  ;;  %v396_v61 = vpop.f32.mrb[4].mxu1 }
 0x2cf   :  { %v318_v62 = vadd.f32 %v317_v60, %v230_v49  ;;  %v403_v63 = vadd.f32 %v1721_v58, %v396_v61  ;;  %v319_v9 = vpop.f32.mrb[5].mxu0  ;;  %v398_v10 = vpop.f32.mrb[5].mxu1 }
 0x2d0   :  { %v320_v11 = vadd.f32 %v319_v9, %v232_v50  ;;  %v321_v12 = vpop.f32.mrb[6].mxu0  ;;  %v400_v13 = vpop.f32.mrb[6].mxu1  ;;  %v404_v22 = vadd.f32 %v1722_v20, %v398_v10 }
 0x2d1   :  { %v335_v14 = vadd.f32 %v2262_v59, %v318_v62  ;;  %v1724_v15 = vmul.f32 -1.442695, %v403_v63  ;;  %v322_v16 = vpop.f32.mrb[7].mxu0  ;;  %v401_v17 = vpop.f32.mrb[7].mxu1 }
 0x2d2   :  { %v336_v40 = vadd.f32 %v2268_v21, %v320_v11  ;;  %v1725_v52 = vmul.f32 -1.442695, %v404_v22 }
 0x2d3   :  { %v1719_v18 = vmul.f32 -1.442695, %v335_v14  ;;  %1834 = vpow2.f32 %v1724_v15 }
 0x2d4   :  { %v1720_v51 = vmul.f32 -1.442695, %v336_v40 }
 0x2d5   :  { %1836 = vpow2.f32 %v1719_v18 }
 0x2d6   :  { %1838 = vtanh.f32 %v404_v22 }
 0x2dd   :  { %v1835_v39 = vpop.eup %1834 }
 0x2de   :  { %v408_v41 = vadd.f32 1.0, %v1835_v39 }
 0x2df   :  { %v1837_v42 = vpop.eup %1836 }
 0x2e0   :  { %v340_v43 = vadd.f32 1.0, %v1837_v42  ;;  %1840 = vrcp.f32 %v408_v41  ;;  %v1839_v45 = vpop.eup %1838 }
 0x2e1   :  { %1842 = vtanh.f32 %v336_v40 }
 0x2e2   :  { %1844 = vrcp.f32 %v340_v43 }
 0x2e3   :  { %1846 = vpow2.f32 %v1720_v51 }
 0x2e4   :  { %1848 = vpow2.f32 %v1725_v52 }
 0x2ea   :  { %v1841_v46 = vpop.eup %1840 }
 0x2eb   :  { %v1843_v47 = vpop.eup %1842  ;;  %v419_v48 = vmul.f32 %v1841_v46, %v1839_v45  ;;  %v418_v61 = vmul.f32 %v1841_v46, %v2232_v44 }
 0x2ec   :  { %v1845_v49 = vpop.eup %1844 }
 0x2ed   :  { %v351_v50 = vmul.f32 %v1845_v49, %v1843_v47  ;;  %v1847_v53 = vpop.eup %1846  ;;  %v350_v56 = vmul.f32 0.0, %v1845_v49 }
 0x2ee   :  { %v347_v54 = vadd.f32 1.0, %v1847_v53  ;;  %v1849_v55 = vpop.eup %1848 }
 0x2ef   :  { %353 = vrot.lane.b32.xlu1 %v351_v50, %s2039_s9  ;;  %v415_v60 = vadd.f32 1.0, %v1849_v55 }
 0x2f0   :  { %1850 = vrcp.f32 %v347_v54 }
 0x2f3   :  { %421 = vrot.lane.b32.xlu1 %v419_v48, %s2039_s9  ;;  %v1730_v48 = vld [vmem:[%s2702_s0 + $0x20] sm:$0xff] }
 0x2fa   :  { %v1851_v9 = vpop.eup %1850 }
 0x361   :  { %v354_v57 = vpop.permute.xlu1 %353 }
 0x362   :  { %v2273_v58 = vadd.f32 %v354_v57, %v350_v56 }
 0x364   :  { %1852 = vtanh.f32 %v2273_v58 }
 0x365   :  { %v422_v62 = vpop.permute.xlu1 %421  ;;  %1854 = vrcp.f32 %v415_v60  ;;  %v1731_v60 = vld [vmem:[%s2702_s0 + $0x28] sm:$0xff] }
 0x366   :  { %v2277_v63 = vadd.f32 %v422_v62, %v418_v61 }
 0x368   :  { %1856 = vtanh.f32 %v2277_v63 }
 0x36e   :  { %v1853_v10 = vpop.eup %1852 }
 0x36f   :  { %v358_v11 = vmul.f32 %v1853_v10, %v1851_v9  ;;  %v1855_v12 = vpop.eup %1854 }
 0x371   :  { %v428_v13 = vpack.c.bf16 %v358_v11, %v358_v11 }
 0x372   :  { %v1857_v14 = vpop.eup %1856 }
 0x373   :  { %430 = vrot.lane.b32.xlu0 %v428_v13, %s2039_s9  ;;  %v426_v15 = vmul.f32 %v1857_v14, %v1855_v12 }
 0x375   :  { %v427_v16 = vpack.c.bf16 %v426_v15, %v426_v15 }
 0x377   :  { %477 = vrot.lane.b32.xlu1 %v427_v16, %s2039_s9 }
 0x3e5   :  { %v431_v17 = vpop.permute.xlu0 %430 }
 0x3e6   :  { %1726 = vmatmul.mubr.msk.bf16.vlgmr.msra.gmra.mrb[8].mxu0 %vm86_vm0, %v431_v17 }
 0x3e7   :  { %551 = vmatpush1.bf16.msra.mxu0 %v2075_v2  ;;  %582 = vmatprep.mubr.bf16.mxu0 %v2038_v1 }
 0x3e8   :  { %552 = vmatprep.subr.bf16.mxu0 %v2081_v3 }
 0x3e9   :  { %v478_v44 = vpop.permute.xlu1 %477 }
 0x3ea   :  { %1727 = vmatmul.mubr.msk.bf16.vlgmr.msra.gmra.mrb[8].mxu1 %vm86_vm0, %v478_v44 }
 0x3eb   :  { %553 = vmatpush1.bf16.msra.mxu0 %v2087_v4  ;;  %624 = vmatpush1.bf16.msra.mxu1 %v2132_v24 }
 0x3ec   :  { %554 = vmatprep.subr.bf16.mxu0 %v2093_v5  ;;  %625 = vmatprep.subr.bf16.mxu1 %v2137_v25 }
 0x3ed   :  { %655 = vmatprep.mubr.bf16.mxu1 %v2038_v1 }
 0x3ef   :  { %555 = vmatpush1.bf16.msra.mxu0 %v2098_v6  ;;  %626 = vmatpush1.bf16.msra.mxu1 %v2143_v26 }
 0x3f0   :  { %556 = vmatprep.subr.bf16.mxu0 %v2105_v7  ;;  %627 = vmatprep.subr.bf16.mxu1 %v2148_v27 }
 0x3f3   :  { %557 = vmatpush1.bf16.msra.mxu0 %v2111_v8  ;;  %628 = vmatpush1.bf16.msra.mxu1 %v2178_v32 }
 0x3f4   :  { %670 = vmatprep.subr.bf16.mxu0 %v2154_v28  ;;  %629 = vmatprep.subr.bf16.mxu1 %v2190_v34 }
 0x3f6   :  { %1732 = vmatmul.mubr.msk.bf16.vlgmr.msra.gmra.mrb[12].mxu0 %vm86_vm0, %v478_v44 }
 0x3f7   :  { %671 = vmatpush1.bf16.msra.mxu0 %v2159_v29  ;;  %630 = vmatpush1.bf16.msra.mxu1 %v2202_v36 }
 0x3f8   :  { %672 = vmatprep.subr.bf16.mxu0 %v2165_v30  ;;  %738 = vmatprep.subr.bf16.mxu1 %v2068_v0 }
 0x3f9   :  { %702 = vmatprep.mubr.bf16.mxu0 %v2038_v1 }
 0x3fb   :  { %673 = vmatpush1.bf16.msra.mxu0 %v2172_v31 }
 0x3fc   :  { %674 = vmatprep.subr.bf16.mxu0 %v2184_v33 }
 0x3ff   :  { %675 = vmatpush1.bf16.msra.mxu0 %v2196_v35 }
 0x400   :  { %676 = vmatprep.subr.bf16.mxu0 %v2208_v37 }
 0x403   :  { %677 = vmatpush1.bf16.msra.mxu0 %v2215_v38 }
 0x404   :  { %811 = vmatprep.subr.bf16.mxu0 %v2127_v23 }
 0x4b9   :  { %v469_v18 = vpop.f32.mrb[8].mxu0 }
 0x4ba   :  { %v471_v19 = vpop.f32.mrb[9].mxu0 }
 0x4bb   :  { %v473_v20 = vpop.f32.mrb[10].mxu0 }
 0x4bc   :  { %v474_v22 = vpop.f32.mrb[11].mxu0 }
 0x4bd   :  { %v516_v39 = vpop.f32.mrb[8].mxu1 }
 0x4be   :  { %v517_v40 = vadd.f32 %v516_v39, %v469_v18  ;;  %v518_v41 = vpop.f32.mrb[9].mxu1 }
 0x4bf   :  { %v519_v42 = vadd.f32 %v518_v41, %v471_v19  ;;  %v520_v43 = vpop.f32.mrb[10].mxu1 }
 0x4c0   :  { %v523_v45 = vadd.f32 %v517_v40, %v2262_v59  ;;  %v521_v46 = vpop.f32.mrb[11].mxu1 }
 0x4c1   :  { %v524_v53 = vadd.f32 %v519_v42, %v2268_v21 }
 0x4c2   :  { %v1728_v47 = vmul.f32 -1.442695, %v523_v45 }
 0x4c3   :  { %v1729_v16 = vmul.f32 -1.442695, %v524_v53 }
 0x4c4   :  { %1858 = vpow2.f32 %v1728_v47 }
 0x4c9   :  { %v584_v49 = vpop.f32.mrb[12].mxu0 }
 0x4ca   :  { %v591_v50 = vadd.f32 %v1730_v48, %v584_v49  ;;  %v586_v51 = vpop.f32.mrb[13].mxu0 }
 0x4cb   :  { %v588_v52 = vpop.f32.mrb[14].mxu0  ;;  %v592_v61 = vadd.f32 %v1731_v60, %v586_v51 }
 0x4cc   :  { %v1733_v54 = vmul.f32 -1.442695, %v591_v50  ;;  %v589_v55 = vpop.f32.mrb[15].mxu0 }
 0x4cd   :  { %v1734_v17 = vmul.f32 -1.442695, %v592_v61 }
 0x4ce   :  { %v1859_v56 = vpop.eup %1858  ;;  %1860 = vpow2.f32 %v1733_v54 }
 0x4cf   :  { %v528_v57 = vadd.f32 1.0, %v1859_v56  ;;  %1862 = vtanh.f32 %v524_v53 }
 0x4d1   :  { %1864 = vrcp.f32 %v528_v57 }
 0x4d2   :  { %1866 = vtanh.f32 %v592_v61 }
 0x4d8   :  { %v1861_v62 = vpop.eup %1860 }
 0x4d9   :  { %v596_v9 = vadd.f32 1.0, %v1861_v62  ;;  %v1863_v10 = vpop.eup %1862 }
 0x4db   :  { %v1865_v11 = vpop.eup %1864  ;;  %1868 = vrcp.f32 %v596_v9 }
 0x4dc   :  { %v539_v12 = vmul.f32 %v1865_v11, %v1863_v10  ;;  %v1867_v13 = vpop.eup %1866  ;;  %1870 = vpow2.f32 %v1729_v16  ;;  %v538_v19 = vmul.f32 %v1865_v11, %v2273_v58 }
 0x4dd   :  { %1872 = vpow2.f32 %v1734_v17 }
 0x4de   :  { %541 = vrot.lane.b32.xlu0 %v539_v12, %s2039_s9  ;;  %v1739_v12 = vld [vmem:[%s2702_s0 + $0x30] sm:$0xff] }
 0x4e5   :  { %v1869_v14 = vpop.eup %1868 }
 0x4e6   :  { %v607_v15 = vmul.f32 %v1869_v14, %v1867_v13  ;;  %v1871_v44 = vpop.eup %1870  ;;  %v606_v41 = vmul.f32 %v1869_v14, %v2277_v63 }
 0x4e7   :  { %v535_v18 = vadd.f32 1.0, %v1871_v44  ;;  %v1873_v39 = vpop.eup %1872 }
 0x4e8   :  { %609 = vrot.lane.b32.xlu1 %v607_v15, %s2039_s9  ;;  %v603_v40 = vadd.f32 1.0, %v1873_v39 }
 0x4e9   :  { %1874 = vrcp.f32 %v535_v18 }
 0x4f3   :  { %v1875_v45 = vpop.eup %1874 }
 0x550   :  { %v542_v20 = vpop.permute.xlu0 %541 }
 0x551   :  { %v2323_v22 = vadd.f32 %v542_v20, %v538_v19  ;;  %v1740_v20 = vld [vmem:[%s2702_s0 + $0x38] sm:$0xff] }
 0x553   :  { %1876 = vtanh.f32 %v2323_v22 }
 0x554   :  { %1878 = vrcp.f32 %v603_v40 }
 0x55a   :  { %v610_v42 = vpop.permute.xlu1 %609 }
 0x55b   :  { %v2327_v43 = vadd.f32 %v610_v42, %v606_v41 }
 0x55d   :  { %v1877_v46 = vpop.eup %1876  ;;  %1880 = vtanh.f32 %v2327_v43 }
 0x55e   :  { %v546_v47 = vmul.f32 %v1877_v46, %v1875_v45  ;;  %v1879_v48 = vpop.eup %1878 }
 0x560   :  { %v616_v58 = vpack.c.bf16 %v546_v47, %v546_v47 }
 0x562   :  { %618 = vrot.lane.b32.xlu0 %v616_v58, %s2039_s9 }
 0x567   :  { %v1881_v49 = vpop.eup %1880 }
 0x568   :  { %v614_v50 = vmul.f32 %v1881_v49, %v1879_v48 }
 0x56a   :  { %v615_v51 = vpack.c.bf16 %v614_v50, %v614_v50 }
 0x56c   :  { %665 = vrot.lane.b32.xlu1 %v615_v51, %s2039_s9 }
 0x5d4   :  { %v619_v52 = vpop.permute.xlu0 %618 }
 0x5d5   :  { %1735 = vmatmul.mubr.msk.bf16.vlgmr.msra.gmra.mrb[12].mxu1 %vm86_vm0, %v619_v52 }
 0x5d6   :  { %739 = vmatpush1.bf16.msra.mxu1 %v2075_v2  ;;  %770 = vmatprep.mubr.bf16.mxu1 %v2038_v1 }
 0x5d7   :  { %740 = vmatprep.subr.bf16.mxu1 %v2081_v3 }
 0x5da   :  { %741 = vmatpush1.bf16.msra.mxu1 %v2087_v4 }
 0x5db   :  { %742 = vmatprep.subr.bf16.mxu1 %v2093_v5 }
 0x5de   :  { %743 = vmatpush1.bf16.msra.mxu1 %v2098_v6  ;;  %v666_v63 = vpop.permute.xlu1 %665 }
 0x5df   :  { %1736 = vmatmul.mubr.msk.bf16.vlgmr.msra.gmra.mrb[16].mxu0 %vm86_vm0, %v666_v63  ;;  %744 = vmatprep.subr.bf16.mxu1 %v2105_v7 }
 0x5e0   :  { %812 = vmatpush1.bf16.msra.mxu0 %v2132_v24  ;;  %843 = vmatprep.mubr.bf16.mxu0 %v2038_v1 }
 0x5e1   :  { %813 = vmatprep.subr.bf16.mxu0 %v2137_v25 }
 0x5e2   :  { %745 = vmatpush1.bf16.msra.mxu1 %v2111_v8 }
 0x5e3   :  { %858 = vmatprep.subr.bf16.mxu1 %v2154_v28 }
 0x5e4   :  { %814 = vmatpush1.bf16.msra.mxu0 %v2143_v26 }
 0x5e5   :  { %1741 = vmatmul.mubr.msk.bf16.vlgmr.msra.gmra.mrb[16].mxu1 %vm86_vm0, %v666_v63  ;;  %815 = vmatprep.subr.bf16.mxu0 %v2148_v27 }
 0x5e6   :  { %859 = vmatpush1.bf16.msra.mxu1 %v2159_v29  ;;  %890 = vmatprep.mubr.bf16.mxu1 %v2038_v1 }
 0x5e7   :  { %860 = vmatprep.subr.bf16.mxu1 %v2165_v30 }
 0x5e8   :  { %816 = vmatpush1.bf16.msra.mxu0 %v2178_v32 }
 0x5e9   :  { %817 = vmatprep.subr.bf16.mxu0 %v2190_v34 }
 0x5ea   :  { %861 = vmatpush1.bf16.msra.mxu1 %v2172_v31 }
 0x5eb   :  { %862 = vmatprep.subr.bf16.mxu1 %v2184_v33 }
 0x5ec   :  { %818 = vmatpush1.bf16.msra.mxu0 %v2202_v36 }
 0x5ed   :  { %926 = vmatprep.subr.bf16.mxu0 %v2068_v0 }
 0x5ee   :  { %863 = vmatpush1.bf16.msra.mxu1 %v2196_v35 }
 0x5ef   :  { %864 = vmatprep.subr.bf16.mxu1 %v2208_v37 }
 0x5f2   :  { %865 = vmatpush1.bf16.msra.mxu1 %v2215_v38 }
 0x5f3   :  { %999 = vmatprep.subr.bf16.mxu1 %v2127_v23 }
 0x6a8   :  { %v657_v53 = vpop.f32.mrb[12].mxu1 }
 0x6a9   :  { %v659_v54 = vpop.f32.mrb[13].mxu1 }
 0x6aa   :  { %v661_v55 = vpop.f32.mrb[14].mxu1 }
 0x6ab   :  { %v662_v56 = vpop.f32.mrb[15].mxu1 }
 0x6b2   :  { %v704_v57 = vpop.f32.mrb[16].mxu0 }
 0x6b3   :  { %v705_v60 = vadd.f32 %v704_v57, %v657_v53  ;;  %v706_v61 = vpop.f32.mrb[17].mxu0 }
 0x6b4   :  { %v707_v62 = vadd.f32 %v706_v61, %v659_v54  ;;  %v708_v9 = vpop.f32.mrb[18].mxu0 }
 0x6b5   :  { %v711_v10 = vadd.f32 %v705_v60, %v2262_v59  ;;  %v709_v11 = vpop.f32.mrb[19].mxu0 }
 0x6b6   :  { %v712_v19 = vadd.f32 %v707_v62, %v2268_v21 }
 0x6b7   :  { %v1737_v13 = vmul.f32 -1.442695, %v711_v10 }
 0x6b8   :  { %v772_v14 = vpop.f32.mrb[16].mxu1  ;;  %v1738_v51 = vmul.f32 -1.442695, %v712_v19 }
 0x6b9   :  { %1882 = vpow2.f32 %v1737_v13  ;;  %v779_v15 = vadd.f32 %v1739_v12, %v772_v14  ;;  %v774_v16 = vpop.f32.mrb[17].mxu1 }
 0x6ba   :  { %v776_v17 = vpop.f32.mrb[18].mxu1  ;;  %v780_v41 = vadd.f32 %v1740_v20, %v774_v16 }
 0x6bb   :  { %v1742_v44 = vmul.f32 -1.442695, %v779_v15  ;;  %v777_v18 = vpop.f32.mrb[19].mxu1 }
 0x6bc   :  { %v1743_v52 = vmul.f32 -1.442695, %v780_v41 }
 0x6bd   :  { %1884 = vpow2.f32 %v1742_v44 }
 0x6be   :  { %1886 = vtanh.f32 %v712_v19 }
 0x6c3   :  { %v1883_v39 = vpop.eup %1882 }
 0x6c4   :  { %v716_v40 = vadd.f32 1.0, %v1883_v39 }
 0x6c6   :  { %1888 = vrcp.f32 %v716_v40 }
 0x6c7   :  { %v1885_v42 = vpop.eup %1884  ;;  %1890 = vtanh.f32 %v780_v41 }
 0x6c8   :  { %v784_v45 = vadd.f32 1.0, %v1885_v42  ;;  %v1887_v46 = vpop.eup %1886  ;;  %v1748_v42 = vld [vmem:[%s2702_s0 + $0x40] sm:$0xff] }
 0x6ca   :  { %1892 = vrcp.f32 %v784_v45 }
 0x6cb   :  { %1894 = vpow2.f32 %v1738_v51 }
 0x6cc   :  { %1896 = vpow2.f32 %v1743_v52 }
 0x6d0   :  { %v1889_v47 = vpop.eup %1888 }
 0x6d1   :  { %v727_v58 = vmul.f32 %v1889_v47, %v1887_v46  ;;  %v1891_v48 = vpop.eup %1890  ;;  %v726_v55 = vmul.f32 %v1889_v47, %v2323_v22 }
 0x6d3   :  { %729 = vrot.lane.b32.xlu0 %v727_v58, %s2039_s9 }
 0x6d4   :  { %v1893_v49 = vpop.eup %1892 }
 0x6d5   :  { %v795_v50 = vmul.f32 %v1893_v49, %v1891_v48  ;;  %v1895_v63 = vpop.eup %1894  ;;  %v794_v61 = vmul.f32 %v1893_v49, %v2327_v43 }
 0x6d6   :  { %v723_v53 = vadd.f32 1.0, %v1895_v63  ;;  %v1897_v54 = vpop.eup %1896  ;;  %v1749_v63 = vld [vmem:[%s2702_s0 + $0x48] sm:$0xff] }
 0x6d7   :  { %797 = vrot.lane.b32.xlu1 %v795_v50, %s2039_s9  ;;  %v791_v60 = vadd.f32 1.0, %v1897_v54 }
 0x6d8   :  { %1898 = vrcp.f32 %v723_v53 }
 0x6e2   :  { %v1899_v10 = vpop.eup %1898 }
 0x745   :  { %v730_v56 = vpop.permute.xlu0 %729 }
 0x746   :  { %v2373_v57 = vadd.f32 %v730_v56, %v726_v55 }
 0x748   :  { %1900 = vtanh.f32 %v2373_v57 }
 0x749   :  { %v798_v62 = vpop.permute.xlu1 %797  ;;  %1902 = vrcp.f32 %v791_v60 }
 0x74a   :  { %v2377_v9 = vadd.f32 %v798_v62, %v794_v61 }
 0x74c   :  { %1904 = vtanh.f32 %v2377_v9 }
 0x752   :  { %v1901_v11 = vpop.eup %1900 }
 0x753   :  { %v734_v12 = vmul.f32 %v1901_v11, %v1899_v10  ;;  %v1903_v13 = vpop.eup %1902 }
 0x755   :  { %v804_v22 = vpack.c.bf16 %v734_v12, %v734_v12 }
 0x756   :  { %v1905_v14 = vpop.eup %1904 }
 0x757   :  { %806 = vrot.lane.b32.xlu0 %v804_v22, %s2039_s9  ;;  %v802_v15 = vmul.f32 %v1905_v14, %v1903_v13 }
 0x759   :  { %v803_v16 = vpack.c.bf16 %v802_v15, %v802_v15 }
 0x75b   :  { %853 = vrot.lane.b32.xlu1 %v803_v16, %s2039_s9 }
 0x7c9   :  { %v807_v17 = vpop.permute.xlu0 %806 }
 0x7ca   :  { %1744 = vmatmul.mubr.msk.bf16.vlgmr.msra.gmra.mrb[20].mxu0 %vm86_vm0, %v807_v17 }
 0x7cb   :  { %927 = vmatpush1.bf16.msra.mxu0 %v2075_v2  ;;  %958 = vmatprep.mubr.bf16.mxu0 %v2038_v1 }
 0x7cc   :  { %928 = vmatprep.subr.bf16.mxu0 %v2081_v3 }
 0x7cd   :  { %v854_v43 = vpop.permute.xlu1 %853 }
 0x7ce   :  { %1745 = vmatmul.mubr.msk.bf16.vlgmr.msra.gmra.mrb[20].mxu1 %vm86_vm0, %v854_v43 }
 0x7cf   :  { %929 = vmatpush1.bf16.msra.mxu0 %v2087_v4  ;;  %1000 = vmatpush1.bf16.msra.mxu1 %v2132_v24 }
 0x7d0   :  { %930 = vmatprep.subr.bf16.mxu0 %v2093_v5  ;;  %1001 = vmatprep.subr.bf16.mxu1 %v2137_v25 }
 0x7d1   :  { %1031 = vmatprep.mubr.bf16.mxu1 %v2038_v1 }
 0x7d3   :  { %931 = vmatpush1.bf16.msra.mxu0 %v2098_v6  ;;  %1002 = vmatpush1.bf16.msra.mxu1 %v2143_v26 }
 0x7d4   :  { %932 = vmatprep.subr.bf16.mxu0 %v2105_v7  ;;  %1003 = vmatprep.subr.bf16.mxu1 %v2148_v27 }
 0x7d7   :  { %933 = vmatpush1.bf16.msra.mxu0 %v2111_v8  ;;  %1004 = vmatpush1.bf16.msra.mxu1 %v2178_v32 }
 0x7d8   :  { %1046 = vmatprep.subr.bf16.mxu0 %v2154_v28  ;;  %1005 = vmatprep.subr.bf16.mxu1 %v2190_v34 }
 0x7da   :  { %1750 = vmatmul.mubr.msk.bf16.vlgmr.msra.gmra.mrb[24].mxu0 %vm86_vm0, %v854_v43 }
 0x7db   :  { %1047 = vmatpush1.bf16.msra.mxu0 %v2159_v29  ;;  %1006 = vmatpush1.bf16.msra.mxu1 %v2202_v36 }
 0x7dc   :  { %1048 = vmatprep.subr.bf16.mxu0 %v2165_v30  ;;  %1114 = vmatprep.subr.bf16.mxu1 %v2068_v0 }
 0x7dd   :  { %1078 = vmatprep.mubr.bf16.mxu0 %v2038_v1 }
 0x7df   :  { %1049 = vmatpush1.bf16.msra.mxu0 %v2172_v31 }
 0x7e0   :  { %1050 = vmatprep.subr.bf16.mxu0 %v2184_v33 }
 0x7e3   :  { %1051 = vmatpush1.bf16.msra.mxu0 %v2196_v35 }
 0x7e4   :  { %1052 = vmatprep.subr.bf16.mxu0 %v2208_v37 }
 0x7e7   :  { %1053 = vmatpush1.bf16.msra.mxu0 %v2215_v38 }
 0x7e8   :  { %1187 = vmatprep.subr.bf16.mxu0 %v2127_v23 }
 0x89d   :  { %v845_v2 = vpop.f32.mrb[20].mxu0 }
 0x89e   :  { %v847_v3 = vpop.f32.mrb[21].mxu0 }
 0x89f   :  { %v849_v4 = vpop.f32.mrb[22].mxu0 }
 0x8a0   :  { %v850_v5 = vpop.f32.mrb[23].mxu0 }
 0x8a1   :  { %v892_v44 = vpop.f32.mrb[20].mxu1 }
 0x8a2   :  { %v893_v0 = vadd.f32 %v892_v44, %v845_v2  ;;  %v894_v18 = vpop.f32.mrb[21].mxu1 }
 0x8a3   :  { %v895_v19 = vadd.f32 %v894_v18, %v847_v3  ;;  %v896_v20 = vpop.f32.mrb[22].mxu1 }
 0x8a4   :  { %v899_v39 = vadd.f32 %v893_v0, %v2262_v59  ;;  %v897_v40 = vpop.f32.mrb[23].mxu1 }
 0x8a5   :  { %v900_v48 = vadd.f32 %v895_v19, %v2268_v21 }
 0x8a6   :  { %v1746_v41 = vmul.f32 -1.442695, %v899_v39 }
 0x8a7   :  { %v1747_v12 = vmul.f32 -1.442695, %v900_v48 }
 0x8a8   :  { %1906 = vpow2.f32 %v1746_v41 }
 0x8ad   :  { %v960_v45 = vpop.f32.mrb[24].mxu0 }
 0x8ae   :  { %v967_v46 = vadd.f32 %v1748_v42, %v960_v45  ;;  %v962_v47 = vpop.f32.mrb[25].mxu0  ;;  %v2443_v42 = vld [vmem:[%s2701_s1 + $0x14] ss:$8 sps:$4 sm:$0xff]   ;;  %v2449_v45 = vld [vmem:[%s2701_s1 + $0x10] ss:$8 sps:$4 sm:$0xff]  }
 0x8af   :  { %v964_v58 = vpop.f32.mrb[26].mxu0  ;;  %v968_v53 = vadd.f32 %v1749_v63, %v962_v47 }
 0x8b0   :  { %v1751_v49 = vmul.f32 -1.442695, %v967_v46  ;;  %v965_v50 = vpop.f32.mrb[27].mxu0  ;;  %v2455_v46 = vld [vmem:[%s2701_s1 + $0x24] ss:$8 sps:$4 sm:$0xff]  }
 0x8b1   :  { %v1752_v13 = vmul.f32 -1.442695, %v968_v53 }
 0x8b2   :  { %v1907_v51 = vpop.eup %1906  ;;  %1908 = vpow2.f32 %v1751_v49  ;;  %v1758_v49 = vld [vmem:[%s2702_s0 + $0x58] sm:$0xff] }
 0x8b3   :  { %v904_v52 = vadd.f32 1.0, %v1907_v51  ;;  %1910 = vtanh.f32 %v900_v48 }
 0x8b5   :  { %1912 = vrcp.f32 %v904_v52 }
 0x8b6   :  { %1914 = vtanh.f32 %v968_v53 }
 0x8bc   :  { %v1909_v54 = vpop.eup %1908 }
 0x8bd   :  { %v972_v55 = vadd.f32 1.0, %v1909_v54  ;;  %v1911_v56 = vpop.eup %1910 }
 0x8bf   :  { %v1913_v60 = vpop.eup %1912  ;;  %1916 = vrcp.f32 %v972_v55 }
 0x8c0   :  { %v915_v61 = vmul.f32 %v1913_v60, %v1911_v56  ;;  %v1915_v62 = vpop.eup %1914  ;;  %1918 = vpow2.f32 %v1747_v12  ;;  %v914_v15 = vmul.f32 %v1913_v60, %v2373_v57 }
 0x8c1   :  { %1920 = vpow2.f32 %v1752_v13 }
 0x8c2   :  { %917 = vrot.lane.b32.xlu0 %v915_v61, %s2039_s9 }
 0x8c9   :  { %v1917_v10 = vpop.eup %1916 }
 0x8ca   :  { %v983_v11 = vmul.f32 %v1917_v10, %v1915_v62  ;;  %v1919_v22 = vpop.eup %1918  ;;  %v982_v3 = vmul.f32 %v1917_v10, %v2377_v9  ;;  %v2436_v9 = vld [vmem:[%s2701_s1] ss:$8 sps:$4 sm:$0xff]  }
 0x8cb   :  { %v911_v14 = vadd.f32 1.0, %v1919_v22  ;;  %v1921_v43 = vpop.eup %1920 }
 0x8cc   :  { %985 = vrot.lane.b32.xlu1 %v983_v11, %s2039_s9  ;;  %v979_v2 = vadd.f32 1.0, %v1921_v43 }
 0x8cd   :  { %1922 = vrcp.f32 %v911_v14 }
 0x8d7   :  { %v1923_v44 = vpop.eup %1922 }
 0x934   :  { %v918_v16 = vpop.permute.xlu0 %917 }
 0x935   :  { %v2423_v17 = vadd.f32 %v918_v16, %v914_v15 }
 0x937   :  { %1924 = vtanh.f32 %v2423_v17 }
 0x938   :  { %1926 = vrcp.f32 %v979_v2 }
 0x93e   :  { %v986_v4 = vpop.permute.xlu1 %985 }
 0x93f   :  { %v2427_v5 = vadd.f32 %v986_v4, %v982_v3 }
 0x941   :  { %v1925_v0 = vpop.eup %1924  ;;  %1928 = vtanh.f32 %v2427_v5 }
 0x942   :  { %v922_v18 = vmul.f32 %v1925_v0, %v1923_v44  ;;  %v1927_v19 = vpop.eup %1926 }
 0x944   :  { %v992_v57 = vpack.c.bf16 %v922_v18, %v922_v18 }
 0x946   :  { %994 = vrot.lane.b32.xlu0 %v992_v57, %s2039_s9 }
 0x94b   :  { %v1929_v20 = vpop.eup %1928 }
 0x94c   :  { %v990_v39 = vmul.f32 %v1929_v20, %v1927_v19 }
 0x94e   :  { %v991_v40 = vpack.c.bf16 %v990_v39, %v990_v39 }
 0x950   :  { %1041 = vrot.lane.b32.xlu1 %v991_v40, %s2039_s9 }
 0x9b8   :  { %v995_v41 = vpop.permute.xlu0 %994 }
 0x9b9   :  { %1753 = vmatmul.mubr.msk.bf16.vlgmr.msra.gmra.mrb[24].mxu1 %vm86_vm0, %v995_v41  ;;  %v2516_v41 = vld [vmem:[%s2701_s1 + $0x40] ss:$8 sps:$4 sm:$0xff]  }
 0x9ba   :  { %1115 = vmatpush1.bf16.msra.mxu1 %v2436_v9  ;;  %1146 = vmatprep.mubr.bf16.mxu1 %v2038_v1 }
 0x9bb   :  { %1116 = vmatprep.subr.bf16.mxu1 %v2443_v42 }
 0x9be   :  { %1117 = vmatpush1.bf16.msra.mxu1 %v2449_v45 }
 0x9bf   :  { %1118 = vmatprep.subr.bf16.mxu1 %v2455_v46 }
 0x9c2   :  { %1119 = vmatpush1.bf16.msra.mxu1 %v2098_v6  ;;  %v1042_v47 = vpop.permute.xlu1 %1041  ;;  %v2480_v6 = vld [vmem:[%s2701_s1 + $0x4] ss:$8 sps:$4 sm:$0xff]  }
 0x9c3   :  { %1754 = vmatmul.mubr.msk.bf16.vlgmr.msra.gmra.mrb[28].mxu0 %vm86_vm0, %v1042_v47  ;;  %1120 = vmatprep.subr.bf16.mxu1 %v2105_v7 }
 0x9c4   :  { %1188 = vmatpush1.bf16.msra.mxu0 %v2132_v24  ;;  %1219 = vmatprep.mubr.bf16.mxu0 %v2038_v1 }
 0x9c5   :  { %1189 = vmatprep.subr.bf16.mxu0 %v2137_v25 }
 0x9c6   :  { %1121 = vmatpush1.bf16.msra.mxu1 %v2111_v8 }
 0x9c7   :  { %1234 = vmatprep.subr.bf16.mxu1 %v2154_v28 }
 0x9c8   :  { %1190 = vmatpush1.bf16.msra.mxu0 %v2143_v26 }
 0x9c9   :  { %1759 = vmatmul.mubr.msk.bf16.vlgmr.msra.gmra.mrb[28].mxu1 %vm86_vm0, %v1042_v47  ;;  %1191 = vmatprep.subr.bf16.mxu0 %v2148_v27  ;;  %v2523_v47 = vld [vmem:[%s2701_s1 + $0x54] ss:$8 sps:$4 sm:$0xff]  }
 0x9ca   :  { %1235 = vmatpush1.bf16.msra.mxu1 %v2159_v29  ;;  %1266 = vmatprep.mubr.bf16.mxu1 %v2038_v1 }
 0x9cb   :  { %1236 = vmatprep.subr.bf16.mxu1 %v2165_v30 }
 0x9cc   :  { %1192 = vmatpush1.bf16.msra.mxu0 %v2178_v32 }
 0x9cd   :  { %1193 = vmatprep.subr.bf16.mxu0 %v2190_v34 }
 0x9ce   :  { %1237 = vmatpush1.bf16.msra.mxu1 %v2172_v31 }
 0x9cf   :  { %1238 = vmatprep.subr.bf16.mxu1 %v2184_v33  ;;  %v1757_v33 = vld [vmem:[%s2702_s0 + $0x50] sm:$0xff] }
 0x9d0   :  { %1194 = vmatpush1.bf16.msra.mxu0 %v2202_v36 }
 0x9d1   :  { %1302 = vmatprep.subr.bf16.mxu0 %v2480_v6 }
 0x9d2   :  { %1239 = vmatpush1.bf16.msra.mxu1 %v2196_v35 }
 0x9d3   :  { %1240 = vmatprep.subr.bf16.mxu1 %v2208_v37 }
 0x9d6   :  { %1241 = vmatpush1.bf16.msra.mxu1 %v2215_v38 }
 0x9d7   :  { %1375 = vmatprep.subr.bf16.mxu1 %v2127_v23 }
 0xa8c   :  { %v1033_v7 = vpop.f32.mrb[24].mxu1 }
 0xa8d   :  { %v1035_v8 = vpop.f32.mrb[25].mxu1 }
 0xa8e   :  { %v1037_v24 = vpop.f32.mrb[26].mxu1 }
 0xa8f   :  { %v1038_v25 = vpop.f32.mrb[27].mxu1  ;;  %v2542_v24 = vld [vmem:[%s2701_s1 + $0x34] ss:$8 sps:$4 sm:$0xff]  }
 0xa90   :  { %v2548_v25 = vld [vmem:[%s2701_s1 + $0x64] ss:$8 sps:$4 sm:$0xff]  }
 0xa96   :  { %v1080_v26 = vpop.f32.mrb[28].mxu0 }
 0xa97   :  { %v1081_v27 = vadd.f32 %v1080_v26, %v1033_v7  ;;  %v1082_v28 = vpop.f32.mrb[29].mxu0  ;;  %v2530_v7 = vld [vmem:[%s2701_s1 + $0x20] ss:$8 sps:$4 sm:$0xff]   ;;  %v2554_v26 = vld [vmem:[%s2701_s1 + $0x30] ss:$8 sps:$4 sm:$0xff]  }
 0xa98   :  { %v1083_v29 = vadd.f32 %v1082_v28, %v1035_v8  ;;  %v1084_v30 = vpop.f32.mrb[30].mxu0  ;;  %v2536_v8 = vld [vmem:[%s2701_s1 + $0x50] ss:$8 sps:$4 sm:$0xff]   ;;  %v2566_v28 = vld [vmem:[%s2703_s2 + $0x4] ss:$8 sps:$4 sm:$0xff]  }
 0xa99   :  { %v1087_v31 = vadd.f32 %v1081_v27, %v2262_v59  ;;  %v1085_v32 = vpop.f32.mrb[31].mxu0  ;;  %v2560_v27 = vld [vmem:[%s2701_s1 + $0x60] ss:$8 sps:$4 sm:$0xff]  }
 0xa9a   :  { %v1088_v48 = vadd.f32 %v1083_v29, %v2268_v21  ;;  %v2572_v29 = vld [vmem:[%s2701_s1 + $0x74] ss:$8 sps:$4 sm:$0xff]   ;;  %v2579_v30 = vld [vmem:[%s2703_s2] ss:$8 sps:$4 sm:$0xff]  }
 0xa9b   :  { %v1755_v34 = vmul.f32 -1.442695, %v1087_v31  ;;  %v2585_v31 = vld [vmem:[%s2701_s1 + $0x70] ss:$8 sps:$4 sm:$0xff]   ;;  %v2591_v32 = vld [vmem:[%s2703_s2 + $0x14] ss:$8 sps:$4 sm:$0xff]  }
 0xa9c   :  { %v1148_v35 = vpop.f32.mrb[28].mxu1  ;;  %v1756_v10 = vmul.f32 -1.442695, %v1088_v48 }
 0xa9d   :  { %1930 = vpow2.f32 %v1755_v34  ;;  %v1155_v23 = vadd.f32 %v1757_v33, %v1148_v35  ;;  %v1150_v36 = vpop.f32.mrb[29].mxu1  ;;  %v2599_v33 = vld [vmem:[%s2703_s2 + $0x10] ss:$8 sps:$4 sm:$0xff]   ;;  %v2605_v34 = vld [vmem:[%s2703_s2 + $0x24] ss:$8 sps:$4 sm:$0xff]  }
 0xa9e   :  { %v1152_v37 = vpop.f32.mrb[30].mxu1  ;;  %v1156_v52 = vadd.f32 %v1758_v49, %v1150_v36  ;;  %v2617_v35 = vld [vmem:[%s2703_s2 + $0x34] ss:$8 sps:$4 sm:$0xff]   ;;  %v2037_v36 = vld [vmem:[%s2701_s1 + $0x44] ss:$8 sps:$4 sm:$0xff]  }
 0xa9f   :  { %v1760_v38 = vmul.f32 -1.442695, %v1155_v23  ;;  %v1153_v58 = vpop.f32.mrb[31].mxu1  ;;  %v2623_v23 = vld [vmem:[%s2703_s2 + $0x30] ss:$8 sps:$4 sm:$0xff]  }
 0xaa0   :  { %v1761_v11 = vmul.f32 -1.442695, %v1156_v52 }
 0xaa1   :  { %1932 = vpow2.f32 %v1760_v38 }
 0xaa2   :  { %1934 = vtanh.f32 %v1088_v48 }
 0xaa7   :  { %v1931_v50 = vpop.eup %1930 }
 0xaa8   :  { %v1092_v51 = vadd.f32 1.0, %v1931_v50 }
 0xaaa   :  { %1936 = vrcp.f32 %v1092_v51 }
 0xaab   :  { %v1933_v63 = vpop.eup %1932  ;;  %1938 = vtanh.f32 %v1156_v52 }
 0xaac   :  { %v1160_v53 = vadd.f32 1.0, %v1933_v63  ;;  %v1935_v54 = vpop.eup %1934 }
 0xaae   :  { %1940 = vrcp.f32 %v1160_v53 }
 0xaaf   :  { %1942 = vpow2.f32 %v1756_v10 }
 0xab0   :  { %1944 = vpow2.f32 %v1761_v11 }
 0xab4   :  { %v1937_v55 = vpop.eup %1936 }
 0xab5   :  { %v1103_v56 = vmul.f32 %v1937_v55, %v1935_v54  ;;  %v1939_v60 = vpop.eup %1938  ;;  %v1102_v14 = vmul.f32 %v1937_v55, %v2423_v17 }
 0xab7   :  { %1105 = vrot.lane.b32.xlu0 %v1103_v56, %s2039_s9  ;;  %v1766_v56 = vld [vmem:[%s2702_s0 + $0x60] sm:$0xff] }
 0xab8   :  { %v1941_v61 = vpop.eup %1940 }
 0xab9   :  { %v1171_v62 = vmul.f32 %v1941_v61, %v1939_v60  ;;  %v1943_v12 = vpop.eup %1942  ;;  %v1170_v2 = vmul.f32 %v1941_v61, %v2427_v5 }
 0xaba   :  { %v1099_v13 = vadd.f32 1.0, %v1943_v12  ;;  %v1945_v22 = vpop.eup %1944 }
 0xabb   :  { %1173 = vrot.lane.b32.xlu1 %v1171_v62, %s2039_s9  ;;  %v1167_v43 = vadd.f32 1.0, %v1945_v22 }
 0xabc   :  { %1946 = vrcp.f32 %v1099_v13 }
 0xac6   :  { %v1947_v44 = vpop.eup %1946 }
 0xb29   :  { %v1106_v15 = vpop.permute.xlu0 %1105 }
 0xb2a   :  { %v2498_v16 = vadd.f32 %v1106_v15, %v1102_v14  ;;  %v1767_v15 = vld [vmem:[%s2702_s0 + $0x68] sm:$0xff] }
 0xb2c   :  { %1948 = vtanh.f32 %v2498_v16 }
 0xb2d   :  { %v1174_v3 = vpop.permute.xlu1 %1173  ;;  %1950 = vrcp.f32 %v1167_v43 }
 0xb2e   :  { %v2502_v4 = vadd.f32 %v1174_v3, %v1170_v2 }
 0xb30   :  { %1952 = vtanh.f32 %v2502_v4 }
 0xb36   :  { %v1949_v0 = vpop.eup %1948 }
 0xb37   :  { %v1110_v18 = vmul.f32 %v1949_v0, %v1947_v44  ;;  %v1951_v57 = vpop.eup %1950 }
 0xb39   :  { %v1180_v17 = vpack.c.bf16 %v1110_v18, %v1110_v18 }
 0xb3a   :  { %v1953_v19 = vpop.eup %1952 }
 0xb3b   :  { %1182 = vrot.lane.b32.xlu0 %v1180_v17, %s2039_s9  ;;  %v1178_v20 = vmul.f32 %v1953_v19, %v1951_v57 }
 0xb3d   :  { %v1179_v39 = vpack.c.bf16 %v1178_v20, %v1178_v20 }
 0xb3f   :  { %1229 = vrot.lane.b32.xlu1 %v1179_v39, %s2039_s9 }
 0xbad   :  { %v1183_v40 = vpop.permute.xlu0 %1182 }
 0xbae   :  { %1762 = vmatmul.mubr.msk.bf16.vlgmr.msra.gmra.mrb[32].mxu0 %vm86_vm0, %v1183_v40 }
 0xbaf   :  { %1303 = vmatpush1.bf16.msra.mxu0 %v2436_v9  ;;  %1334 = vmatprep.mubr.bf16.mxu0 %v2038_v1 }
 0xbb0   :  { %1304 = vmatprep.subr.bf16.mxu0 %v2443_v42 }
 0xbb1   :  { %v1230_v5 = vpop.permute.xlu1 %1229 }
 0xbb2   :  { %1763 = vmatmul.mubr.msk.bf16.vlgmr.msra.gmra.mrb[32].mxu1 %vm86_vm0, %v1230_v5 }
 0xbb3   :  { %1305 = vmatpush1.bf16.msra.mxu0 %v2449_v45  ;;  %1376 = vmatpush1.bf16.msra.mxu1 %v2516_v41 }
 0xbb4   :  { %1306 = vmatprep.subr.bf16.mxu0 %v2455_v46  ;;  %1377 = vmatprep.subr.bf16.mxu1 %v2523_v47 }
 0xbb5   :  { %1407 = vmatprep.mubr.bf16.mxu1 %v2038_v1 }
 0xbb7   :  { %1307 = vmatpush1.bf16.msra.mxu0 %v2530_v7  ;;  %1378 = vmatpush1.bf16.msra.mxu1 %v2536_v8 }
 0xbb8   :  { %1308 = vmatprep.subr.bf16.mxu0 %v2542_v24  ;;  %1379 = vmatprep.subr.bf16.mxu1 %v2548_v25 }
 0xbbb   :  { %1309 = vmatpush1.bf16.msra.mxu0 %v2554_v26  ;;  %1380 = vmatpush1.bf16.msra.mxu1 %v2560_v27 }
 0xbbc   :  { %1422 = vmatprep.subr.bf16.mxu0 %v2566_v28  ;;  %1381 = vmatprep.subr.bf16.mxu1 %v2572_v29 }
 0xbbe   :  { %1768 = vmatmul.mubr.msk.bf16.vlgmr.msra.gmra.mrb[36].mxu0 %vm86_vm0, %v1230_v5 }
 0xbbf   :  { %1423 = vmatpush1.bf16.msra.mxu0 %v2579_v30  ;;  %1382 = vmatpush1.bf16.msra.mxu1 %v2585_v31 }
 0xbc0   :  { %1424 = vmatprep.subr.bf16.mxu0 %v2591_v32  ;;  %1490 = vmatprep.subr.bf16.mxu1 %v2480_v6  ;;  %v2611_v6 = vld [vmem:[%s2703_s2 + $0x20] ss:$8 sps:$4 sm:$0xff]  }
 0xbc1   :  { %1454 = vmatprep.mubr.bf16.mxu0 %v2038_v1 }
 0xbc3   :  { %1425 = vmatpush1.bf16.msra.mxu0 %v2599_v33 }
 0xbc4   :  { %1426 = vmatprep.subr.bf16.mxu0 %v2605_v34 }
 0xbc7   :  { %1427 = vmatpush1.bf16.msra.mxu0 %v2611_v6 }
 0xbc8   :  { %1428 = vmatprep.subr.bf16.mxu0 %v2617_v35 }
 0xbcb   :  { %1429 = vmatpush1.bf16.msra.mxu0 %v2623_v23 }
 0xbcc   :  { %1563 = vmatprep.subr.bf16.mxu0 %v2037_v36 }
 0xc81   :  { %v1221_v37 = vpop.f32.mrb[32].mxu0 }
 0xc82   :  { %v1223_v38 = vpop.f32.mrb[33].mxu0 }
 0xc83   :  { %v1225_v58 = vpop.f32.mrb[34].mxu0 }
 0xc84   :  { %v1226_v48 = vpop.f32.mrb[35].mxu0 }
 0xc85   :  { %v1268_v49 = vpop.f32.mrb[32].mxu1 }
 0xc86   :  { %v1269_v50 = vadd.f32 %v1268_v49, %v1221_v37  ;;  %v1270_v51 = vpop.f32.mrb[33].mxu1 }
 0xc87   :  { %v1271_v52 = vadd.f32 %v1270_v51, %v1223_v38  ;;  %v1272_v63 = vpop.f32.mrb[34].mxu1 }
 0xc88   :  { %v1275_v53 = vadd.f32 %v1269_v50, %v2262_v59  ;;  %v1273_v54 = vpop.f32.mrb[35].mxu1 }
 0xc89   :  { %v1276_v11 = vadd.f32 %v1271_v52, %v2268_v21 }
 0xc8a   :  { %v1764_v55 = vmul.f32 -1.442695, %v1275_v53 }
 0xc8b   :  { %v1765_v20 = vmul.f32 -1.442695, %v1276_v11 }
 0xc8c   :  { %1954 = vpow2.f32 %v1764_v55 }
 0xc91   :  { %v1336_v60 = vpop.f32.mrb[36].mxu0 }
 0xc92   :  { %v1343_v61 = vadd.f32 %v1766_v56, %v1336_v60  ;;  %v1338_v62 = vpop.f32.mrb[37].mxu0 }
 0xc93   :  { %v1340_v10 = vpop.f32.mrb[38].mxu0  ;;  %v1344_v43 = vadd.f32 %v1767_v15, %v1338_v62 }
 0xc94   :  { %v1769_v12 = vmul.f32 -1.442695, %v1343_v61  ;;  %v1341_v13 = vpop.f32.mrb[39].mxu0 }
 0xc95   :  { %v1770_v39 = vmul.f32 -1.442695, %v1344_v43 }
 0xc96   :  { %v1955_v22 = vpop.eup %1954  ;;  %1956 = vpow2.f32 %v1769_v12 }
 0xc97   :  { %v1280_v14 = vadd.f32 1.0, %v1955_v22  ;;  %1958 = vtanh.f32 %v1276_v11 }
 0xc99   :  { %1960 = vrcp.f32 %v1280_v14 }
 0xc9a   :  { %1962 = vtanh.f32 %v1344_v43 }
 0xca0   :  { %v1957_v2 = vpop.eup %1956 }
 0xca1   :  { %v1348_v3 = vadd.f32 1.0, %v1957_v2  ;;  %v1959_v44 = vpop.eup %1958 }
 0xca3   :  { %v1961_v0 = vpop.eup %1960  ;;  %1964 = vrcp.f32 %v1348_v3 }
 0xca4   :  { %v1291_v18 = vmul.f32 %v1961_v0, %v1959_v44  ;;  %v1963_v57 = vpop.eup %1962  ;;  %1966 = vpow2.f32 %v1765_v20  ;;  %v1290_v36 = vmul.f32 %v1961_v0, %v2498_v16 }
 0xca5   :  { %1968 = vpow2.f32 %v1770_v39 }
 0xca6   :  { %1293 = vrot.lane.b32.xlu0 %v1291_v18, %s2039_s9 }
 0xcad   :  { %v1965_v17 = vpop.eup %1964 }
 0xcae   :  { %v1359_v19 = vmul.f32 %v1965_v17, %v1963_v57  ;;  %v1967_v40 = vpop.eup %1966  ;;  %v1358_v49 = vmul.f32 %v1965_v17, %v2502_v4 }
 0xcaf   :  { %v1287_v5 = vadd.f32 1.0, %v1967_v40  ;;  %v1969_v58 = vpop.eup %1968 }
 0xcb0   :  { %1361 = vrot.lane.b32.xlu1 %v1359_v19, %s2039_s9  ;;  %v1355_v48 = vadd.f32 1.0, %v1969_v58 }
 0xcb1   :  { %1970 = vrcp.f32 %v1287_v5 }
 0xcbb   :  { %v1971_v52 = vpop.eup %1970 }
 0xd18   :  { %v1294_v37 = vpop.permute.xlu0 %1293 }
 0xd19   :  { %v2640_v38 = vadd.f32 %v1294_v37, %v1290_v36 }
 0xd1b   :  { %1972 = vtanh.f32 %v2640_v38 }
 0xd1c   :  { %1974 = vrcp.f32 %v1355_v48 }
 0xd22   :  { %v1362_v50 = vpop.permute.xlu1 %1361 }
 0xd23   :  { %v2644_v51 = vadd.f32 %v1362_v50, %v1358_v49 }
 0xd25   :  { %v1973_v63 = vpop.eup %1972  ;;  %1976 = vtanh.f32 %v2644_v51 }
 0xd26   :  { %v1298_v53 = vmul.f32 %v1973_v63, %v1971_v52  ;;  %v1975_v54 = vpop.eup %1974 }
 0xd28   :  { %v1368_v16 = vpack.c.bf16 %v1298_v53, %v1298_v53 }
 0xd2a   :  { %1370 = vrot.lane.b32.xlu0 %v1368_v16, %s2039_s9 }
 0xd2f   :  { %v1977_v55 = vpop.eup %1976 }
 0xd30   :  { %v1366_v56 = vmul.f32 %v1977_v55, %v1975_v54 }
 0xd32   :  { %v1367_v60 = vpack.c.bf16 %v1366_v56, %v1366_v56 }
 0xd34   :  { %1417 = vrot.lane.b32.xlu1 %v1367_v60, %s2039_s9 }
 0xd9c   :  { %v1371_v61 = vpop.permute.xlu0 %1370 }
 0xd9d   :  { %1771 = vmatmul.mubr.msk.bf16.vlgmr.msra.gmra.mrb[36].mxu1 %vm86_vm0, %v1371_v61 }
 0xd9e   :  { %1491 = vmatpush1.bf16.msra.mxu1 %v2436_v9  ;;  %1522 = vmatprep.mubr.bf16.mxu1 %v2038_v1 }
 0xd9f   :  { %1492 = vmatprep.subr.bf16.mxu1 %v2443_v42 }
 0xda2   :  { %1493 = vmatpush1.bf16.msra.mxu1 %v2449_v45 }
 0xda3   :  { %1494 = vmatprep.subr.bf16.mxu1 %v2455_v46 }
 0xda6   :  { %1495 = vmatpush1.bf16.msra.mxu1 %v2530_v7  ;;  %v1418_v4 = vpop.permute.xlu1 %1417 }
 0xda7   :  { %1772 = vmatmul.mubr.msk.bf16.vlgmr.msra.gmra.mrb[40].mxu0 %vm86_vm0, %v1418_v4  ;;  %1496 = vmatprep.subr.bf16.mxu1 %v2542_v24 }
 0xda8   :  { %1564 = vmatpush1.bf16.msra.mxu0 %v2516_v41  ;;  %1595 = vmatprep.mubr.bf16.mxu0 %v2038_v1 }
 0xda9   :  { %1565 = vmatprep.subr.bf16.mxu0 %v2523_v47 }
 0xdaa   :  { %1497 = vmatpush1.bf16.msra.mxu1 %v2554_v26  ;;  %v1775_v26 = vld [vmem:[%s2702_s0 + $0x70] sm:$0xff] }
 0xdab   :  { %1610 = vmatprep.subr.bf16.mxu1 %v2566_v28 }
 0xdac   :  { %1566 = vmatpush1.bf16.msra.mxu0 %v2536_v8 }
 0xdad   :  { %1777 = vmatmul.mubr.msk.bf16.vlgmr.msra.gmra.mrb[40].mxu1 %vm86_vm0, %v1418_v4  ;;  %1567 = vmatprep.subr.bf16.mxu0 %v2548_v25 }
 0xdae   :  { %1611 = vmatpush1.bf16.msra.mxu1 %v2579_v30  ;;  %1642 = vmatprep.mubr.bf16.mxu1 %v2038_v1 }
 0xdaf   :  { %1612 = vmatprep.subr.bf16.mxu1 %v2591_v32 }
 0xdb0   :  { %1568 = vmatpush1.bf16.msra.mxu0 %v2560_v27 }
 0xdb1   :  { %1569 = vmatprep.subr.bf16.mxu0 %v2572_v29 }
 0xdb2   :  { %1613 = vmatpush1.bf16.msra.mxu1 %v2599_v33 }
 0xdb3   :  { %1614 = vmatprep.subr.bf16.mxu1 %v2605_v34 }
 0xdb4   :  { %1570 = vmatpush1.bf16.msra.mxu0 %v2585_v31 }
 0xdb6   :  { %1615 = vmatpush1.bf16.msra.mxu1 %v2611_v6  ;;  %v1776_v6 = vld [vmem:[%s2702_s0 + $0x78] sm:$0xff] }
 0xdb7   :  { %1616 = vmatprep.subr.bf16.mxu1 %v2617_v35 }
 0xdba   :  { %1617 = vmatpush1.bf16.msra.mxu1 %v2623_v23 }
 0xe70   :  { %v1409_v9 = vpop.f32.mrb[36].mxu1 }
 0xe71   :  { %v1411_v1 = vpop.f32.mrb[37].mxu1 }
 0xe72   :  { %v1413_v42 = vpop.f32.mrb[38].mxu1 }
 0xe73   :  { %v1414_v45 = vpop.f32.mrb[39].mxu1 }
 0xe7a   :  { %v1456_v46 = vpop.f32.mrb[40].mxu0 }
 0xe7b   :  { %v1457_v41 = vadd.f32 %v1456_v46, %v1409_v9  ;;  %v1458_v47 = vpop.f32.mrb[41].mxu0 }
 0xe7c   :  { %v1459_v7 = vadd.f32 %v1458_v47, %v1411_v1  ;;  %v1460_v8 = vpop.f32.mrb[42].mxu0 }
 0xe7d   :  { %v1463_v24 = vadd.f32 %v1457_v41, %v2262_v59  ;;  %v1461_v25 = vpop.f32.mrb[43].mxu0 }
 0xe7e   :  { %v1464_v34 = vadd.f32 %v1459_v7, %v2268_v21 }
 0xe7f   :  { %v1773_v27 = vmul.f32 -1.442695, %v1463_v24 }
 0xe80   :  { %v1524_v28 = vpop.f32.mrb[40].mxu1  ;;  %v1774_v2 = vmul.f32 -1.442695, %v1464_v34 }
 0xe81   :  { %1978 = vpow2.f32 %v1773_v27  ;;  %v1531_v29 = vadd.f32 %v1775_v26, %v1524_v28  ;;  %v1526_v30 = vpop.f32.mrb[41].mxu1 }
 0xe82   :  { %v1528_v31 = vpop.f32.mrb[42].mxu1  ;;  %v1532_v62 = vadd.f32 %v1776_v6, %v1526_v30 }
 0xe83   :  { %v1778_v32 = vmul.f32 -1.442695, %v1531_v29  ;;  %v1529_v33 = vpop.f32.mrb[43].mxu1 }
 0xe84   :  { %v1779_v3 = vmul.f32 -1.442695, %v1532_v62 }
 0xe85   :  { %1980 = vpow2.f32 %v1778_v32 }
 0xe86   :  { %1982 = vtanh.f32 %v1464_v34 }
 0xe8b   :  { %v1979_v35 = vpop.eup %1978 }
 0xe8c   :  { %v1468_v23 = vadd.f32 1.0, %v1979_v35 }
 0xe8e   :  { %1984 = vrcp.f32 %v1468_v23 }
 0xe8f   :  { %v1981_v10 = vpop.eup %1980  ;;  %1986 = vtanh.f32 %v1532_v62 }
 0xe90   :  { %v1536_v11 = vadd.f32 1.0, %v1981_v10  ;;  %v1983_v12 = vpop.eup %1982 }
 0xe92   :  { %1988 = vrcp.f32 %v1536_v11 }
 0xe93   :  { %1990 = vpow2.f32 %v1774_v2 }
 0xe94   :  { %1992 = vpow2.f32 %v1779_v3 }
 0xe98   :  { %v1985_v13 = vpop.eup %1984 }
 0xe99   :  { %v1479_v22 = vmul.f32 %v1985_v13, %v1983_v12  ;;  %v1987_v14 = vpop.eup %1986  ;;  %v1478_v57 = vmul.f32 %v1985_v13, %v2640_v38 }
 0xe9b   :  { %1481 = vrot.lane.b32.xlu0 %v1479_v22, %s2039_s9 }
 0xe9c   :  { %v1989_v15 = vpop.eup %1988 }
 0xe9d   :  { %v1547_v43 = vmul.f32 %v1989_v15, %v1987_v14  ;;  %v1991_v44 = vpop.eup %1990  ;;  %v1546_v39 = vmul.f32 %v1989_v15, %v2644_v51 }
 0xe9e   :  { %v1475_v0 = vadd.f32 1.0, %v1991_v44  ;;  %v1993_v18 = vpop.eup %1992 }
 0xe9f   :  { %1549 = vrot.lane.b32.xlu1 %v1547_v43, %s2039_s9  ;;  %v1543_v20 = vadd.f32 1.0, %v1993_v18 }
 0xea0   :  { %1994 = vrcp.f32 %v1475_v0 }
 0xeaa   :  { %v1995_v36 = vpop.eup %1994 }
 0xf0d   :  { %v1482_v17 = vpop.permute.xlu0 %1481 }
 0xf0e   :  { %v1484_v19 = vadd.f32 %v1482_v17, %v1478_v57 }
 0xf10   :  { %1996 = vtanh.f32 %v1484_v19 }
 0xf11   :  { %v1550_v40 = vpop.permute.xlu1 %1549  ;;  %1998 = vrcp.f32 %v1543_v20 }
 0xf12   :  { %v1552_v5 = vadd.f32 %v1550_v40, %v1546_v39 }
 0xf14   :  { %2000 = vtanh.f32 %v1552_v5 }
 0xf1a   :  { %v1997_v37 = vpop.eup %1996 }
 0xf1b   :  { %v1486_v58 = vmul.f32 %v1997_v37, %v1995_v36  ;;  %v1999_v48 = vpop.eup %1998 }
 0xf1d   :  { %v1556_v49 = vpack.c.bf16 %v1486_v58, %v1486_v58 }
 0xf1e   :  { %v2001_v50 = vpop.eup %2000 }
 0xf1f   :  { %1558 = vrot.lane.b32.xlu0 %v1556_v49, %s2039_s9  ;;  %v1554_v38 = vmul.f32 %v2001_v50, %v1999_v48 }
 0xf21   :  { %v1555_v52 = vpack.c.bf16 %v1554_v38, %v1554_v38 }
 0xf23   :  { %1605 = vrot.lane.b32.xlu1 %v1555_v52, %s2039_s9 }
 0xf91   :  { %v1559_v63 = vpop.permute.xlu0 %1558 }
 0xf92   :  { %1780 = vmatmul.mubr.msk.bf16.vlgmr.msra.gmra.mrb[44].mxu0 %vm86_vm0, %v1559_v63 }
 0xf95   :  { %v1606_v51 = vpop.permute.xlu1 %1605 }
 0xf96   :  { %1781 = vmatmul.mubr.msk.bf16.vlgmr.msra.gmra.mrb[44].mxu1 %vm86_vm0, %v1606_v51 }
0x1065   :  { %v1597_v53 = vpop.f32.mrb[44].mxu0 }
0x1066   :  { %v1599_v16 = vpop.f32.mrb[45].mxu0 }
0x1067   :  { %v1601_v54 = vpop.f32.mrb[46].mxu0 }
0x1068   :  { %v1602_v55 = vpop.f32.mrb[47].mxu0 }
0x1069   :  { %v1644_v56 = vpop.f32.mrb[44].mxu1 }
0x106a   :  { %v1645_v60 = vadd.f32 %v1644_v56, %v1597_v53  ;;  %v1646_v61 = vpop.f32.mrb[45].mxu1 }
0x106b   :  { %v1647_v4 = vadd.f32 %v1646_v61, %v1599_v16  ;;  %v1648_v9 = vpop.f32.mrb[46].mxu1 }
0x106c   :  { %v1651_v1 = vadd.f32 %v1645_v60, %v2262_v59  ;;  %v1649_v42 = vpop.f32.mrb[47].mxu1 }
0x106d   :  { %v1652_v46 = vadd.f32 %v1647_v4, %v2268_v21 }
0x106e   :  { %v1782_v45 = vmul.f32 -1.442695, %v1651_v1 }
0x106f   :  { %v1783_v25 = vmul.f32 -1.442695, %v1652_v46 }
0x1070   :  { %2002 = vpow2.f32 %v1782_v45 }
0x1071   :  { %2004 = vtanh.f32 %v1652_v46 }
0x107a   :  { %v2003_v41 = vpop.eup %2002 }
0x107b   :  { %v1656_v47 = vadd.f32 1.0, %v2003_v41  ;;  %v2005_v7 = vpop.eup %2004 }
0x107d   :  { %2006 = vrcp.f32 %v1656_v47 }
0x107e   :  { %2008 = vpow2.f32 %v1783_v25 }
0x1087   :  { %v2007_v8 = vpop.eup %2006 }
0x1088   :  { %v1667_v24 = vmul.f32 %v2007_v8, %v2005_v7  ;;  %v2009_v26 = vpop.eup %2008  ;;  %v1666_v28 = vmul.f32 %v2007_v8, %v1484_v19 }
0x1089   :  { %v1663_v27 = vadd.f32 1.0, %v2009_v26 }
0x108a   :  { %1669 = vrot.lane.b32.xlu0 %v1667_v24, %s2039_s9 }
0x108b   :  { %2010 = vrcp.f32 %v1663_v27 }
0x1095   :  { %v2011_v30 = vpop.eup %2010 }
0x10fc   :  { %v1670_v59 = vpop.permute.xlu0 %1669 }
0x10fd   :  { %v1672_v29 = vadd.f32 %v1670_v59, %v1666_v28 }
0x10ff   :  { %2012 = vtanh.f32 %v1672_v29 }
0x1109   :  { %v2013_v21 = vpop.eup %2012 }
0x110a   :  { %v1674_v31 = vmul.f32 %v2013_v21, %v2011_v30 }
0x110c   :  { %1676 = vrot.lane.b32.xlu1 %v1674_v31, %s2039_s9 }
0x117e   :  { %v1677_v32 = vpop.permute.xlu1 %1676 }
0x117f   :  { %1679 = vst.msk [vmem:[%s2705_s4] sm:$0xff] %vm86_vm0, %v1677_v32 }

</bundles_post_ra>
